<compile_context>
chip_gen: v6e
topology: v6e:2x2x1
jax: 0.10.0
libtpu: 0.0.40
codegen_flags: <defaults>
</compile_context>

<pallas_src>
import math
from functools import partial

import jax
import jax.numpy as jnp
from jax.experimental import pallas as pl
from jax.experimental.pallas import tpu as pltpu


def _pick_tile(n, pref, minimum):
    """Largest power-of-two tile <= pref dividing n.

    Unlike the old `_fit`, this never silently falls back to a huge
    full-extent block (VMEM hazard). If the whole extent already fits in one
    preferred-size block we use it (always a legal block shape)."""
    if n <= pref:
        return n
    t = pref
    while t >= minimum:
        if n % t == 0:
            return t
        t //= 2
    raise ValueError(
        f"extent {n} has no power-of-two tile divisor in [{minimum}, {pref}]; "
        f"pad the input to a multiple of {minimum}.")


# ----------------------------------------------------------------------------
# Kernel 1: tiled fused projection  y[M, 3D] = x[M, D] @ W[D, 3D] + b
# ----------------------------------------------------------------------------
def _proj_kernel(x_ref, w_ref, b_ref, o_ref, acc_ref):
    @pl.when(pl.program_id(2) == 0)
    def _():
        acc_ref[...] = jnp.zeros_like(acc_ref)

    acc_ref[...] += jnp.dot(x_ref[...], w_ref[...],
                            preferred_element_type=jnp.float32)

    @pl.when(pl.program_id(2) == pl.num_programs(2) - 1)
    def _():
        o_ref[...] = (acc_ref[...] + b_ref[...]).astype(o_ref.dtype)


def pallas_proj(x2d, w, b_row, *, tm=256, tn=256, tk=256):
    # NOTE: on v5e prefer tk=128 (128-deep MXU); 256 targets v6e/v7x.
    M, K = x2d.shape
    N = w.shape[1]
    tm = _pick_tile(M, tm, 8)
    tn = _pick_tile(N, tn, 128)
    tk = _pick_tile(K, tk, 128)
    return pl.pallas_call(
        _proj_kernel,
        out_shape=jax.ShapeDtypeStruct((M, N), jnp.bfloat16),
        grid=(M // tm, N // tn, K // tk),
        in_specs=[
            pl.BlockSpec((tm, tk), lambda i, j, k: (i, k)),
            pl.BlockSpec((tk, tn), lambda i, j, k: (k, j)),
            pl.BlockSpec((1, tn), lambda i, j, k: (0, j)),
        ],
        out_specs=pl.BlockSpec((tm, tn), lambda i, j, k: (i, j)),
        scratch_shapes=[pltpu.VMEM((tm, tn), jnp.float32)],
        compiler_params=pltpu.CompilerParams(
            dimension_semantics=("parallel", "parallel", "arbitrary")),
    )(x2d, w, b_row)


# ----------------------------------------------------------------------------
# Kernel 2: one-shot RMSNorm + interleaved RoPE pre-pass over q and k halves
# ----------------------------------------------------------------------------
def _prepass_kernel(q_ref, k_ref, cos_ref, sin_ref, qw_ref, kw_ref,
                    qo_ref, ko_ref, *, scale, eps):
    cos = cos_ref[...]
    sin = sin_ref[...]
    # Lane-parity select mask computed once and shared by the q and k paths.
    lane = jax.lax.broadcasted_iota(jnp.int32, cos.shape, 1)
    even = (lane % 2) == 0
    hd = cos.shape[-1]

    def norm_rope(x, w):
        x = x.astype(jnp.float32)
        ms = jnp.mean(x * x, axis=-1, keepdims=True)
        xn = x * jax.lax.rsqrt(ms + eps) * w
        # out[2i]   = x[2i]*cos - x[2i+1]*sin
        # out[2i+1] = x[2i+1]*cos + x[2i]*sin   (cos/sin duplicated per pair)
        x_up = pltpu.roll(xn, 1, axis=1)        # x_up[:, j] = x[:, j-1]
        x_dn = pltpu.roll(xn, hd - 1, axis=1)   # x_dn[:, j] = x[:, j+1]
        swapped = jnp.where(even, -x_dn, x_up)
        return xn * cos + swapped * sin

    qo_ref[0] = (norm_rope(q_ref[0], qw_ref[...]) * scale).astype(qo_ref.dtype)
    ko_ref[0] = norm_rope(k_ref[0], kw_ref[...]).astype(ko_ref.dtype)


def pallas_prepass(qkv, cos, sin, q_w, k_w, *, num_heads, scale, eps, tt=256):
    """qkv: [B, Tseg, 3D] packed (q|k|v). Returns roped q, k each [B, Tseg, D]."""
    B, Tseg, threeD = qkv.shape
    D = threeD // 3
    H = num_heads
    Hd = D // H
    tt = _pick_tile(Tseg, tt, 16)
    kern = partial(_prepass_kernel, scale=scale, eps=eps)
    return pl.pallas_call(
        kern,
        out_shape=(jax.ShapeDtypeStruct((B, Tseg, D), jnp.bfloat16),
                   jax.ShapeDtypeStruct((B, Tseg, D), jnp.bfloat16)),
        grid=(B, H, Tseg // tt),
        in_specs=[
            pl.BlockSpec((1, tt, Hd), lambda b, h, t: (b, t, h)),        # q head
            pl.BlockSpec((1, tt, Hd), lambda b, h, t: (b, t, H + h)),    # k head
            pl.BlockSpec((tt, Hd), lambda b, h, t: (t, 0)),              # cos
            pl.BlockSpec((tt, Hd), lambda b, h, t: (t, 0)),              # sin
            pl.BlockSpec((1, Hd), lambda b, h, t: (0, 0)),               # q norm w
            pl.BlockSpec((1, Hd), lambda b, h, t: (0, 0)),               # k norm w
        ],
        out_specs=(pl.BlockSpec((1, tt, Hd), lambda b, h, t: (b, t, h)),
                   pl.BlockSpec((1, tt, Hd), lambda b, h, t: (b, t, h))),
        compiler_params=pltpu.CompilerParams(
            dimension_semantics=("parallel", "parallel", "parallel")),
    )(qkv, qkv, cos, sin, q_w.reshape(1, Hd), k_w.reshape(1, Hd))


# ----------------------------------------------------------------------------
# Kernel 3: head-blocked flash attention (q/k already normed + roped + scaled)
# ----------------------------------------------------------------------------
def _flash_kernel(q_ref, k_ref, v_ref, mask_ref, o_ref,
                  m_s, l_s, acc_s, *, hb, head_dim):
    ki = pl.program_id(3)

    @pl.when(ki == 0)
    def _init():
        m_s[...] = jnp.full_like(m_s, -jnp.inf)
        l_s[...] = jnp.zeros_like(l_s)
        acc_s[...] = jnp.zeros_like(acc_s)

    # int8 visibility mask: shared across the hb heads of this step.
    valid = mask_ref[0] != 0
    neg = jnp.float32(-1e30)

    for h in range(hb):                                   # small static loop
        sl = slice(h * head_dim, (h + 1) * head_dim)
        q = q_ref[0, :, sl]                               # (tq, Hd) bf16
        k = k_ref[0, :, sl]                               # (tkv, Hd) bf16
        s = jax.lax.dot_general(q, k, (((1,), (1,)), ((), ())),
                                preferred_element_type=jnp.float32)
        s = jnp.where(valid, s, neg)

        m_prev = m_s[h]
        m_new = jnp.maximum(m_prev, jnp.max(s, axis=-1, keepdims=True))
        alpha = jnp.exp(m_prev - m_new)
        p = jnp.exp(s - m_new)
        l_s[h] = alpha * l_s[h] + jnp.sum(p, axis=-1, keepdims=True)
        acc_s[h] = alpha * acc_s[h] + jnp.dot(
            p.astype(jnp.bfloat16), v_ref[0, :, sl],
            preferred_element_type=jnp.float32)
        m_s[h] = m_new

    @pl.when(ki == pl.num_programs(3) - 1)
    def _final():
        for h in range(hb):
            inv_l = pl.reciprocal(l_s[h], approx=True)
            o_ref[0, :, h * head_dim:(h + 1) * head_dim] = (
                acc_s[h] * inv_l).astype(o_ref.dtype)


def pallas_flash_attention(q, k, v, mask_i8, *, num_heads, hb=None,
                           tq=256, tkv=256):
    B, T, D = q.shape
    H = num_heads
    Hd = D // H
    if hb is None:
        hb = max(d for d in (4, 2, 1) if H % d == 0)
    assert H % hb == 0
    tq = _pick_tile(T, tq, 32)     # 32: int8 mask sublane tile
    tkv = _pick_tile(T, tkv, 128)
    kern = partial(_flash_kernel, hb=hb, head_dim=Hd)
    return pl.pallas_call(
        kern,
        out_shape=jax.ShapeDtypeStruct((B, T, D), jnp.bfloat16),
        grid=(B, H // hb, T // tq, T // tkv),
        in_specs=[
            pl.BlockSpec((1, tq, hb * Hd), lambda b, g, qi, ki: (b, qi, g)),
            pl.BlockSpec((1, tkv, hb * Hd), lambda b, g, qi, ki: (b, ki, g)),
            pl.BlockSpec((1, tkv, hb * Hd), lambda b, g, qi, ki: (b, ki, g)),
            pl.BlockSpec((1, tq, tkv), lambda b, g, qi, ki: (b, qi, ki)),
        ],
        out_specs=pl.BlockSpec((1, tq, hb * Hd), lambda b, g, qi, ki: (b, qi, g)),
        scratch_shapes=[
            pltpu.VMEM((hb, tq, 1), jnp.float32),    # running max
            pltpu.VMEM((hb, tq, 1), jnp.float32),    # running sum
            pltpu.VMEM((hb, tq, Hd), jnp.float32),   # output accumulator
        ],
        compiler_params=pltpu.CompilerParams(
            dimension_semantics=("parallel", "parallel", "parallel",
                                 "arbitrary")),
    )(q, k, v, mask_i8)


# ----------------------------------------------------------------------------
# Module forward (prefill): glue in plain JAX, hot paths in Pallas kernels
# ----------------------------------------------------------------------------
def dual_stream_attention(params, x, c, cos, sin, vis_mask_i8, eps=1e-6,
                          hb=None, flash_tq=256, flash_tkv=256):
    """x: [B,L,D], c: [B,S,D], cos/sin: [S+L, Hd] (interleaved-duplicated),
    vis_mask_i8: [B, S+L, S+L] int8 (1 = attend, 0 = blocked)."""
    B, L, D = x.shape
    S = c.shape[1]
    H = params["num_heads"]
    Hd = D // H
    scale = 1.0 / math.sqrt(Hd)

    # Fused [D, 3D] weights (q | k | v), pre-transposed once from torch layout
    # (in a real model these would be folded offline).
    def fused_wb(qk_w, v_w, v_b):
        w = jnp.concatenate([qk_w.T, v_w.T], axis=1).astype(jnp.bfloat16)
        b = jnp.concatenate(
            [jnp.zeros((2 * D,), jnp.float32), v_b]).reshape(1, 3 * D)
        return w, b

    w_c, b_c = fused_wb(params["c_qk_c_w"], params["c_v_c_w"], params["c_v_c_b"])
    w_x, b_x = fused_wb(params["c_qk_x_w"], params["c_v_x_w"], params["c_v_x_b"])

    qkv_c = pallas_proj(c.reshape(B * S, D).astype(jnp.bfloat16), w_c, b_c)
    qkv_x = pallas_proj(x.reshape(B * L, D).astype(jnp.bfloat16), w_x, b_x)
    qkv_c = qkv_c.reshape(B, S, 3 * D)
    qkv_x = qkv_x.reshape(B, L, 3 * D)

    # One-shot norm+RoPE pre-pass per stream (cond positions [0,S), x [S,S+L)).
    q_c, k_c = pallas_prepass(qkv_c, cos[:S], sin[:S],
                              params["q_norm_c_w"], params["k_norm_c_w"],
                              num_heads=H, scale=scale, eps=eps)
    q_x, k_x = pallas_prepass(qkv_x, cos[S:], sin[S:],
                              params["q_norm_x_w"], params["k_norm_x_w"],
                              num_heads=H, scale=scale, eps=eps)

    q = jnp.concatenate([q_c, q_x], axis=1)                       # [B, T, D]
    k = jnp.concatenate([k_c, k_x], axis=1)
    v = jnp.concatenate([qkv_c[:, :, 2 * D:], qkv_x[:, :, 2 * D:]], axis=1)

    y = pallas_flash_attention(q, k, v, vis_mask_i8, num_heads=H, hb=hb,
                               tq=flash_tq, tkv=flash_tkv)        # [B, T, D] bf16
    return y[:, S:], y[:, :S]


# ----------------------------------------------------------------------------
# Pure-JAX f32 reference (mirrors the PyTorch forward) for correctness checking
# ----------------------------------------------------------------------------
def reference(params, x, c, cos_half, sin_half, attn_bias, eps=1e-6):
    B, L, D = x.shape
    S = c.shape[1]
    H = params["num_heads"]
    Hd = D // H

    def lin(t, w, b):
        return jnp.einsum("bld,od->blo", t, w) + b

    qk_c = lin(c, params["c_qk_c_w"], 0.0)
    q_c, k_c = qk_c[..., :D], qk_c[..., D:]
    v_c = lin(c, params["c_v_c_w"], params["c_v_c_b"])
    qk_x = lin(x, params["c_qk_x_w"], 0.0)
    q_x, k_x = qk_x[..., :D], qk_x[..., D:]
    v_x = lin(x, params["c_v_x_w"], params["c_v_x_b"])

    def to_mha(t):
        return t.reshape(B, -1, H, Hd).transpose(0, 2, 1, 3)

    def rms(t, w):
        return t * jax.lax.rsqrt(jnp.mean(t * t, -1, keepdims=True) + eps) * w

    q = jnp.concatenate([rms(to_mha(q_c), params["q_norm_c_w"]),
                         rms(to_mha(q_x), params["q_norm_x_w"])], axis=2)
    k = jnp.concatenate([rms(to_mha(k_c), params["k_norm_c_w"]),
                         rms(to_mha(k_x), params["k_norm_x_w"])], axis=2)
    v = jnp.concatenate([to_mha(v_c), to_mha(v_x)], axis=2)

    def rope(t):
        tr = t.reshape(*t.shape[:-1], Hd // 2, 2)
        a, b = tr[..., 0], tr[..., 1]
        ch = cos_half[None, None, :, :]
        sh = sin_half[None, None, :, :]
        return jnp.stack([a * ch - b * sh, a * sh + b * ch], -1).reshape(t.shape)

    qr, kr = rope(q), rope(k)
    s = jnp.einsum("bhqd,bhkd->bhqk", qr, kr) / math.sqrt(Hd)
    s = s + attn_bias[:, None, :, :]
    p = jax.nn.softmax(s, axis=-1)
    y = jnp.einsum("bhqk,bhkd->bhqd", p, v)
    y = y.transpose(0, 2, 1, 3).reshape(B, S + L, D)
    return y[:, S:], y[:, :S]


# ----------------------------------------------------------------------------
if __name__ == "__main__":
    # Small but tiling-exercising shapes: T=512 -> 2x2 flash tiles at 256,
    # K=512 -> 2 accumulation steps in the projection, H=4 with hb=2 ->
    # 2 head groups x 2 heads per flash block.
    B, S, L, D, H = 2, 256, 256, 512, 4
    Hd = D // H
    T = S + L

    key = jax.random.PRNGKey(0)
    ks = jax.random.split(key, 16)

    params = {
        "num_heads": H,
        "c_qk_x_w": jax.random.normal(ks[0], (2 * D, D), jnp.float32) * 0.02,
        "c_v_x_w":  jax.random.normal(ks[1], (D, D), jnp.float32) * 0.02,
        "c_v_x_b":  jax.random.normal(ks[2], (D,), jnp.float32) * 0.02,
        "q_norm_x_w": 1.0 + 0.1 * jax.random.normal(ks[3], (Hd,), jnp.float32),
        "k_norm_x_w": 1.0 + 0.1 * jax.random.normal(ks[4], (Hd,), jnp.float32),
        "c_qk_c_w": jax.random.normal(ks[5], (2 * D, D), jnp.float32) * 0.02,
        "c_v_c_w":  jax.random.normal(ks[6], (D, D), jnp.float32) * 0.02,
        "c_v_c_b":  jax.random.normal(ks[7], (D,), jnp.float32) * 0.02,
        "q_norm_c_w": 1.0 + 0.1 * jax.random.normal(ks[8], (Hd,), jnp.float32),
        "k_norm_c_w": 1.0 + 0.1 * jax.random.normal(ks[9], (Hd,), jnp.float32),
    }

    x = jax.random.normal(ks[10], (B, L, D), jnp.float32)
    c = jax.random.normal(ks[11], (B, S, D), jnp.float32)

    # RoPE tables (precompute_freqs_cis equivalent), shared across batch.
    theta = 10000.0
    inv_freq = 1.0 / (theta ** (jnp.arange(0, Hd, 2, dtype=jnp.float32) / Hd))
    pos = jnp.arange(T, dtype=jnp.float32)
    angles = pos[:, None] * inv_freq[None, :]              # [T, Hd/2]
    cos_half, sin_half = jnp.cos(angles), jnp.sin(angles)
    cos_full = jnp.repeat(cos_half, 2, axis=-1)            # [T, Hd]
    sin_full = jnp.repeat(sin_half, 2, axis=-1)

    # Visibility mask [B, T, T]: random visibility + self-visibility.
    # Kernel path consumes int8 (1 = attend); reference consumes additive bias.
    vis = jax.random.bernoulli(ks[12], 0.8, (B, T, T))
    vis = jnp.logical_or(vis, jnp.eye(T, dtype=bool)[None])
    mask_i8 = vis.astype(jnp.int8)
    attn_bias = jnp.where(vis, 0.0, -1e9).astype(jnp.float32)

    y_x, y_c = dual_stream_attention(params, x, c, cos_full, sin_full,
                                     mask_i8, hb=2)
    jax.block_until_ready((y_x, y_c))

    r_x, r_c = reference(params, x, c, cos_half, sin_half, attn_bias)
    assert y_x.shape == (B, L, D) and y_c.shape == (B, S, D)
    # bf16 MXU operands + bf16 output -> compare against the f32 reference
    # with bf16-level tolerance.
    assert jnp.allclose(y_x.astype(jnp.float32), r_x, atol=3e-2, rtol=3e-2), \
        float(jnp.max(jnp.abs(y_x.astype(jnp.float32) - r_x)))
    assert jnp.allclose(y_c.astype(jnp.float32), r_c, atol=3e-2, rtol=3e-2), \
        float(jnp.max(jnp.abs(y_c.astype(jnp.float32) - r_c)))

    print("KERNEL_OK")
</pallas_src>

<mosaic_0001>
module attributes {stable_mosaic.version = 11 : i64} {
  func.func @_proj_kernel(%arg0: i32, %arg1: i32, %arg2: i32, %arg3: memref<256x256xbf16, #tpu.memory_space<vmem>>, %arg4: memref<256x256xbf16, #tpu.memory_space<vmem>>, %arg5: memref<1x256xf32, #tpu.memory_space<vmem>>, %arg6: memref<256x256xbf16, #tpu.memory_space<vmem>>, %arg7: memref<256x256xf32, #tpu.memory_space<vmem>>) attributes {dimension_semantics = [#tpu.dimension_semantics<parallel>, #tpu.dimension_semantics<parallel>, #tpu.dimension_semantics<arbitrary>], iteration_bounds = array<i64: 2, 6, 2>, scalar_prefetch = 0 : i64, scratch_operands = 1 : i64, tpu.core_type = #tpu.core_type<tc>, window_params = [{transform_indices = @transform_0, window_bounds = array<i64: 256, 256>}, {transform_indices = @transform_1, window_bounds = array<i64: 256, 256>}, {transform_indices = @transform_2, window_bounds = array<i64: 1, 256>}, {transform_indices = @transform_3, window_bounds = array<i64: 256, 256>}]} {
    %c0_i32 = arith.constant 0 : i32
    %0 = arith.cmpi eq, %arg2, %c0_i32 : i32
    %1 = arith.extui %0 : i1 to i32
    %c0_i32_0 = arith.constant 0 : i32
    %2 = arith.cmpi ne, %1, %c0_i32_0 : i32
    scf.if %2 {
      %cst_9 = arith.constant 0.000000e+00 : f32
      %12 = vector.broadcast %cst_9 : f32 to vector<256x256xf32>
      %c0_10 = arith.constant 0 : index
      %c0_11 = arith.constant 0 : index
      %13 = vector.load %arg7[%c0_10, %c0_11] : memref<256x256xf32, #tpu.memory_space<vmem>>, vector<256x256xf32>
      tpu.vector_store %arg7[%c0_10, %c0_11], %12 {strides = array<i32>} : memref<256x256xf32, #tpu.memory_space<vmem>>, vector<256x256xf32>,
    } else {
    }
    %c0 = arith.constant 0 : index
    %c0_1 = arith.constant 0 : index
    %3 = vector.load %arg7[%c0, %c0_1] : memref<256x256xf32, #tpu.memory_space<vmem>>, vector<256x256xf32>
    %c0_2 = arith.constant 0 : index
    %c0_3 = arith.constant 0 : index
    %4 = vector.load %arg3[%c0_2, %c0_3] : memref<256x256xbf16, #tpu.memory_space<vmem>>, vector<256x256xbf16>
    %c0_4 = arith.constant 0 : index
    %c0_5 = arith.constant 0 : index
    %5 = vector.load %arg4[%c0_4, %c0_5] : memref<256x256xbf16, #tpu.memory_space<vmem>>, vector<256x256xbf16>
    %cst = arith.constant dense<0.000000e+00> : vector<256x256xf32>
    %6 = tpu.matmul %4, %5, %cst {dimension_numbers = #tpu.dot_dimension_numbers<[1], [0], [0], [1], [0, 0, 1, 1], [], []>} : vector<256x256xbf16>, vector<256x256xbf16>, vector<256x256xf32> -> vector<256x256xf32>
    %7 = arith.addf %3, %6 : vector<256x256xf32>
    %c0_6 = arith.constant 0 : index
    %c0_7 = arith.constant 0 : index
    %8 = vector.load %arg7[%c0_6, %c0_7] : memref<256x256xf32, #tpu.memory_space<vmem>>, vector<256x256xf32>
    tpu.vector_store %arg7[%c0_6, %c0_7], %7 {strides = array<i32>} : memref<256x256xf32, #tpu.memory_space<vmem>>, vector<256x256xf32>,
    %c1_i32 = arith.constant 1 : i32
    %9 = arith.cmpi eq, %arg2, %c1_i32 : i32
    %10 = arith.extui %9 : i1 to i32
    %c0_i32_8 = arith.constant 0 : i32
    %11 = arith.cmpi ne, %10, %c0_i32_8 : i32
    scf.if %11 {
      %c0_9 = arith.constant 0 : index
      %c0_10 = arith.constant 0 : index
      %12 = vector.load %arg7[%c0_9, %c0_10] : memref<256x256xf32, #tpu.memory_space<vmem>>, vector<256x256xf32>
      %c0_11 = arith.constant 0 : index
      %c0_12 = arith.constant 0 : index
      %13 = vector.load %arg5[%c0_11, %c0_12] : memref<1x256xf32, #tpu.memory_space<vmem>>, vector<1x256xf32>
      %14 = vector.broadcast %13 : vector<1x256xf32> to vector<256x256xf32>
      %15 = arith.addf %12, %14 : vector<256x256xf32>
      %16 = arith.truncf %15 : vector<256x256xf32> to vector<256x256xbf16>
      %c0_13 = arith.constant 0 : index
      %c0_14 = arith.constant 0 : index
      %17 = vector.load %arg6[%c0_13, %c0_14] : memref<256x256xbf16, #tpu.memory_space<vmem>>, vector<256x256xbf16>
      tpu.vector_store %arg6[%c0_13, %c0_14], %16 {strides = array<i32>} : memref<256x256xbf16, #tpu.memory_space<vmem>>, vector<256x256xbf16>,
    } else {
    }
    return
  }
  func.func @transform_0(%arg0: i32, %arg1: i32, %arg2: i32) -> (i32, i32) {
    %c0_i32 = arith.constant 0 : i32
    return %arg0, %arg2 : i32, i32
  }
  func.func @transform_1(%arg0: i32, %arg1: i32, %arg2: i32) -> (i32, i32) {
    %c0_i32 = arith.constant 0 : i32
    return %arg2, %arg1 : i32, i32
  }
  func.func @transform_2(%arg0: i32, %arg1: i32, %arg2: i32) -> (i32, i32) {
    %c0_i32 = arith.constant 0 : i32
    %c0_i32_0 = arith.constant 0 : i32
    return %c0_i32, %arg1 : i32, i32
  }
  func.func @transform_3(%arg0: i32, %arg1: i32, %arg2: i32) -> (i32, i32) {
    %c0_i32 = arith.constant 0 : i32
    return %arg0, %arg1 : i32, i32
  }
}

</mosaic_0001>

<bundles_post_ra>
// kernel: tpu_custom_call.1
= control target key start
LH: loop header
LB: loop body
LE: loop exit
PB: predicated region body
PF: predicated region fallthrough
CT: control target
= control target key end

     0   :  { %s3096_s0 = inlined_call_operand.hbm [shape: bf16[512,512], index: 0, kind: input, shape index: {}]   ;;  %s3097_s1 = inlined_call_operand.hbm [shape: bf16[512,1536], index: 1, kind: input, shape index: {}]   ;;  %s3098_s2 = inlined_call_operand.hbm [shape: f32[1,1536], index: 2, kind: input, shape index: {}]   ;;  %s3099_s3 = inlined_call_operand.hbm [shape: bf16[512,1536], index: 3, kind: output, shape index: {}]  }
   0x1   :  { %3119 = sst [smem:[#allocation31_spill]] %s3096_s0 }
   0x2   :  { %3120 = sst [smem:[#allocation32_spill]] %s3097_s1 }
   0x3   :  { %3121 = sst [smem:[#allocation33_spill]] %s3098_s2 }
   0x4   :  { %3122 = sst [smem:[#allocation34_spill]] %s3099_s3 }
   0x5   :  { %8 = vsyncpa [#allocation4], 0 }
   0x6   :  { %10 = vsyncpa [#allocation4 + $0x1], 0 }
   0x7   :  { %11 = vsyncpa [#allocation7], 0 }
   0x8   :  { %13 = vsyncpa [#allocation7 + $0x1], 0 }
   0x9   :  { %14 = vsyncpa [#allocation5], 0 }
   0xa   :  { %16 = vsyncpa [#allocation5 + $0x1], 0  ;;  %s2451_s12 = smov 0   ;;  %s2453_s13 = smov 0  }
   0xb   :  { %s2455_s14 = smov 0   ;;  %s2457_s15 = smov 0  }
   0xc   :  { %s2459_s16 = smov 0   ;;  %s2461_s17 = smov 0  }
   0xd   :  { %s2463_s18 = smov 0   ;;  %s2465_s19 = smov 0  }
   0xe   :  { %s2467_s20 = smov 0   ;;  %s2469_s21 = smov 0  }
   0xf   :  { %s2471_s22 = smov 0   ;;  %s2473_s23 = smov 0  }
  0x10   :  { %s2475_s24 = smov 0   ;;  %s2477_s25 = smov 0  }
  0x11   :  { %s2479_s26 = smov 0   ;;  %s2481_s27 = smov 0  }
  0x12   :  { %s2483_s28 = smov 0   ;;  %s2485_s29 = smov 0  }
  0x13   :  { %s2487_s30 = smov 0  }
  0x14 LB: > { %3123 = sst [smem:[#allocation14_spill]] %s2345_s12  ;;  %s34_s4 = sadd.s32 1, %s2405_s27  ;;  %s2417_s30 = sphi %s2487_s30, %s22_s30   ;;  %s2413_s29 = sphi %s2485_s29, %s3202_s29   ;;  %s2409_s28 = sphi %s2483_s28, %s3188_s28   ;;  %s2405_s27 = sphi %s2481_s27, %s3201_s27   ;;  %s2401_s26 = sphi %s2479_s26, %s3200_s26   ;;  %s2397_s25 = sphi %s2477_s25, %s3186_s25   ;;  %s2393_s24 = sphi %s2475_s24, %s3185_s24   ;;  %s2389_s23 = sphi %s2473_s23, %s3199_s23   ;;  %s2385_s22 = sphi %s2471_s22, %s3198_s22   ;;  %s2381_s21 = sphi %s2469_s21, %s3197_s21   ;;  %s2377_s20 = sphi %s2467_s20, %s3184_s20   ;;  %s2373_s19 = sphi %s2465_s19, %s3196_s19   ;;  %s2369_s18 = sphi %s2463_s18, %s3195_s18   ;;  %s2365_s17 = sphi %s2461_s17, %s3194_s17   ;;  %s2361_s16 = sphi %s2459_s16, %s3193_s16   ;;  %s2357_s15 = sphi %s2457_s15, %s3182_s15   ;;  %s2353_s14 = sphi %s2455_s14, %s3191_s14   ;;  %s2349_s13 = sphi %s2453_s13, %s3189_s13   ;;  %s2345_s12 = sphi %s2451_s12, %s3181_s12  }
  0x15   : > { %3124 = sst [smem:[#allocation15_spill]] %s2349_s13  ;;  %s37_s5 = sadd.s32 1, %s2409_s28 }
  0x16   : > { %3125 = sst [smem:[#allocation16_spill]] %s2357_s15  ;;  %p35_p0 = scmp.ge.s32.totalorder %s34_s4, 2 }
  0x17   : > { %3126 = sst [smem:[#allocation17_spill]] %s2361_s16  ;;  %p3114_p1 = scmp.eq.s32.totalorder %s2417_s30, 0 }
  0x18   : > { %3127 = sst [smem:[#allocation18_spill]] %s2369_s18  ;;  %s78_s6 = sadd.s32 1, %s2377_s20 }
  0x19   : > { %3128 = sst [smem:[#allocation19_spill]] %s2377_s20  ;;  %p85_p2 = scmp.ne.s32.totalorder %s2377_s20, %s2373_s19 }
  0x1a   : > { %3129 = sst [smem:[#allocation20_spill]] %s2393_s24  ;;  %s3204_s4 = smov (%p35_p0, %s34_s4), 0 }
  0x1b   : > { %3130 = sst [smem:[#allocation21_spill]] %s2397_s25  ;;  %s3206_s5 = smov (!%p35_p0, %s37_s5), %s2409_s28 }
  0x1c   : > { %3131 = sst [smem:[#allocation22_spill]] %s2401_s26  ;;  %s2559_s7 = ssub.s32 %s2405_s27, %s3204_s4 }
  0x1d   : > { %3132 = sst [smem:[#allocation23_spill]] %s2405_s27  ;;  %p2563_p3 = por %p85_p2, %p3114_p1 }
  0x1e   : > { %3133 = sst [smem:[#allocation24_spill]] %s2409_s28  ;;  %p39_p4 = scmp.ge.s32.totalorder %s3206_s5, 6 }
  0x1f   : > { %3134 = sst [smem:[#allocation25_spill]] %s3204_s4  ;;  %p91_p5 = scmp.ne.s32.totalorder %s2373_s19, %s2369_s18 }
  0x20   : > { %p3115_p6 = scmp.lt.s32.totalorder %s2417_s30, 24  ;;  %s193_s11 = sand.u32 1, %s2417_s30  }
  0x21   : > { %s2574_s9 = scalar_select %p39_p4, 0, %s3206_s5  }
  0x22   : > { %s195_s3 = sand.u32 1, %s2377_s20   ;;  %s1677_s25 = sshll.u32 %s2409_s28, 1 }
  0x23   : > { %3136 = sst [smem:[#allocation26_spill]] %s2574_s9  ;;  %s2578_s10 = ssub.s32 %s2409_s28, %s2574_s9 }
  0x24   : > { %s75_s4 = sor.u32 %s2578_s10, %s2559_s7  ;;  %s1675_s26 = sshll.u32 %s195_s3, 8 }
  0x25   : > { %p76_p7 = scmp.eq.s32.totalorder %s75_s4, 0  ;;  %s1859_s2 = smul.u32 384, %s2405_s27 }
  0x26   : > { %s197_s12 = scalar_lea.vmem [#allocation6], %s1675_s26  ;;  %p2593_p8 = pnand %p3115_p6, %p2563_p3 }
  0x27   : > { %s2586_s24 = scalar_select %p76_p7, %s2377_s20, %s78_s6  }
  0x28   : > { %s207_s13 = sshll.u32 %s197_s12, 4  ;;  %s204_s9 = sadd.s32 %s1859_s2, %s1677_s25  ;;  %s208_s13 = int_to_ptr.vmem [resolvable:$true] %s207_s13 }
  0x29   : > { %3137 = sst [smem:[#allocation27_spill]] %s2586_s24  ;;  %s1679_s16 = sshll.u32 %s204_s9, 6 }
  0x2a   : > { %s3139_s1 = sld [smem:[#allocation32_spill]]  ;;  %s2600_s28 = scalar_lea.sflag [#allocation7], %s193_s11 }
  0x2b   : > { %3140 = sst [smem:[#allocation28_spill]] %s2600_s28  ;;  %p2143_p9 = pneg %p2593_p8 }
  0x2c   : > { %s2154_s26 = scalar_lea.vmem %s208_s13, 4096  ;;  %s2419_s12 = smov [#allocation6]  }
  0x2d   : > { %p2155_p10 = scmp.ne.s32.totalorder %s208_s13, %s2154_s26  ;;  %s2159_s6 = sshll.u32 %s2419_s12, 4  ;;  %s2160_s6 = int_to_ptr.vmem [resolvable:$false] %s2159_s6 }
  0x2e   : > { %s2161_s8 = scalar_lea.vmem %s2160_s6, 8192  ;;  %p2162_p13 = scmp.lt.s32.totalorder %s208_s13, %s2160_s6 }
  0x2f   : > { %p2157_p11 = pnand %p2155_p10, %p2143_p9  ;;  %p2163_p0 = scmp.lt.s32.totalorder %s2161_s8, %s2154_s26 }
  0x30   : > { %s206_s3 = scalar_lea.hbm %s3139_s1, %s1679_s16 }
  0x31   : > { %p2158_p12 = pneg %p2157_p11  ;;  %p2164_p2 = por %p2163_p0, %p2162_p13 }
  0x33   : > { %p2165_p3 = pnand %p2164_p2, %p2158_p12 }
  0x35   : > { %2168 = shalt.err (!%p2165_p3)
}
  0x36   : > { %s2420_s2 = smov 768   ;;  %s3108_s16 = smov 128  }
  0x37   : > { %s3109_s18 = smov 8   ;;  %p1683_p7 = scmp.ge.s32.totalorder %s2417_s30, 1 }
  0x38   : > { %1875 = dma.hbm_to_vmem [thread:$0]  (!%p2593_p8), %s206_s3, 4096, %s208_s13, %s2600_s28, %s2420_s2, %s3108_s16, %s3109_s18  }
  0x39   : > { %p234_p9 = scmp.lt.s32.totalorder %s2417_s30, 25  ;;  %s41_s9 = sadd.s32 1, %s2413_s29 }
  0x3a   : > { %s3208_s9 = smov (!%p39_p4, %s41_s9), %s2413_s29  ;;  %s50_s11 = sadd.s32 1, %s2389_s23 }
  0x3b   : > { %p2611_p10 = pnand %p1683_p7, %p234_p9  ;;  %p57_p11 = scmp.ne.s32.totalorder %s2389_s23, %s2385_s22 }
  0x3c   : > { %p43_p12 = scmp.ge.s32.totalorder %s3208_s9, 2  ;;  %p63_p13 = scmp.ne.s32.totalorder %s2385_s22, %s2381_s21 }
  0x3d   : > { %s3141_s25 = scalar_select %p2611_p10, 1, 0 }
  0x3e   : > { %p2626_p8 = por %p3114_p1, %p57_p11  ;;  %s132_s15 = sadd.s32 1, %s2353_s14 }
  0x3f   : > { %3142 = sst [smem:[#allocation29_spill]] %s3141_s25  ;;  %s3210_s9 = smov (%p43_p12, %s3208_s9), 0 }
  0x40   : > { %3144 = sst [smem:[#allocation30_spill]] %s3210_s9  ;;  %s169_s4 = sand.u32 1, %s2389_s23  }
  0x41   : > { %s1672_s3 = sshll.u32 %s2405_s27, 1  ;;  %s45_s5 = ssub.s32 %s2413_s29, %s3210_s9 }
  0x42   : > { %s47_s26 = sor.u32 %s2559_s7, %s45_s5  ;;  %s129_s12 = sor.u32 %s2578_s10, %s45_s5 }
  0x43   : > { %p48_p4 = scmp.eq.s32.totalorder %s47_s26, 0  ;;  %p130_p0 = scmp.eq.s32.totalorder %s129_s12, 0 }
  0x44   : > { %s1670_s6 = sshll.u32 %s169_s4, 8  ;;  %s1793_s8 = sshll.u32 %s2413_s29, 7 }
  0x45   : > { %s2641_s2 = scalar_select %p48_p4, %s2389_s23, %s50_s11  }
  0x46   : > { %s2644_s16 = scalar_select %p130_p0, %s2353_s14, %s132_s15  }
  0x47   : > { %s180_s18 = sadd.s32 %s1793_s8, %s1672_s3  ;;  %s173_s24 = scalar_lea.vmem [#allocation3], %s1670_s6 }
  0x48   : > { %s1674_s1 = sshll.u32 %s180_s18, 6  ;;  %s183_s20 = sshll.u32 %s173_s24, 4  ;;  %s184_s20 = int_to_ptr.vmem [resolvable:$true] %s183_s20 }
  0x49   : > { %s3145_s0 = sld [smem:[#allocation31_spill]]  ;;  %p2653_p2 = pnand %p3115_p6, %p2626_p8 }
  0x4a   : > { %s170_s11 = scalar_lea.sflag [#allocation4], %s169_s4  ;;  %s2182_s15 = scalar_lea.vmem %s184_s20, 4096 }
  0x4b   : > { %p2171_p3 = pneg %p2653_p2  ;;  %p2183_p7 = scmp.ne.s32.totalorder %s184_s20, %s2182_s15 }
  0x4c   : > { %s2423_s24 = smov [#allocation3]  }
  0x4d   : > { %p2185_p9 = pnand %p2183_p7, %p2171_p3  ;;  %s2187_s18 = sshll.u32 %s2423_s24, 4  ;;  %s2188_s18 = int_to_ptr.vmem [resolvable:$false] %s2187_s18 }
  0x4e   : > { %s2189_s28 = scalar_lea.vmem %s2188_s18, 8192  ;;  %p2190_p12 = scmp.lt.s32.totalorder %s184_s20, %s2188_s18 }
  0x4f   : > { %s182_s27 = scalar_lea.hbm %s3145_s0, %s1674_s1  ;;  %p2186_p11 = pneg %p2185_p9 }
  0x50   : > { %p2191_p4 = scmp.lt.s32.totalorder %s2189_s28, %s2182_s15 }
  0x52   : > { %p2192_p0 = por %p2191_p4, %p2190_p12 }
  0x54   : > { %p2193_p1 = pnand %p2192_p0, %p2186_p11 }
  0x56   : > { %2196 = shalt.err (!%p2193_p1)
}
  0x57   : > { %s2424_s1 = smov 256   ;;  %s3147_s25 = smov 8  }
  0x58   : > { %s3148_s13 = smov 128   ;;  %s3150_s3 = sld [smem:[#allocation17_spill]] }
  0x59   : > { %s3151_s5 = sld [smem:[#allocation16_spill]]  ;;  %s2664_s6 = sadd.s32 4294967295, %s2417_s30  }
  0x5a   : > { %s3152_s26 = sld [smem:[#allocation15_spill]]  ;;  %s1667_s8 = sadd.s32 4294967294, %s2417_s30  }
  0x5b   : > { %1872 = dma.hbm_to_vmem [thread:$0]  (!%p2653_p2), %s182_s27, 4096, %s184_s20, %s170_s11, %s2424_s1, %s3148_s13, %s3147_s25  }
  0x5c   : > { %s3153_s12 = sld [smem:[#allocation14_spill]]  ;;  %p64_p1 = scmp.eq.s32.totalorder %s2664_s6, 0 }
  0x5d   : > { %p102_p8 = scmp.eq.s32.totalorder %s2578_s10, 0  ;;  %s3154_s7 = sld [smem:[#allocation24_spill]] }
  0x5e   : > { %s104_s15 = sadd.s32 1, %s2365_s17  ;;  %p2673_p3 = por %p64_p1, %p63_p13 }
  0x5f   : > { %p2680_p7 = por %p91_p5, %p64_p1  ;;  %p111_p2 = scmp.ne.s32.totalorder %s2365_s17, %s3150_s3 }
  0x60   : > { %s2685_s27 = scalar_select %p102_p8, %s2365_s17, %s104_s15  }
  0x61   : > { %s3156_s20 = scalar_select %p2680_p7, 1, 0 }
  0x62   : > { %p117_p9 = scmp.ne.s32.totalorder %s3150_s3, %s3151_s5  ;;  %p142_p11 = scmp.ne.s32.totalorder %s2353_s14, %s3152_s26 }
  0x63   : > { %p143_p12 = scmp.eq.s32.totalorder %s2664_s6, 23  ;;  %p3157_p4 = scmp.eq.s32.totalorder %s2417_s30, 0 }
  0x64   : > { %p2700_p13 = por %p117_p9, %p64_p1  ;;  %p148_p8 = scmp.ne.s32.totalorder %s3152_s26, %s3153_s12 }
  0x65   : > { %p2696_p0 = por %p111_p2, %p3157_p4  ;;  %p2704_p5 = por %p143_p12, %p142_p11 }
  0x66   : > { %p149_p6 = scmp.eq.s32.totalorder %s1667_s8, 23  ;;  %s219_s18 = sand.u32 1, %s2365_s17  }
  0x67   : > { %s3160_s11 = scalar_select %p2704_p5, 1, 0 }
  0x68   : > { %s1680_s28 = sshll.u32 %s219_s18, 1  ;;  %s1794_s1 = sshll.u32 %s3154_s7, 5 }
  0x69   : > { %p2712_p7 = por %p149_p6, %p148_p8  ;;  %s3162_s3 = sld [smem:[#allocation33_spill]] }
  0x6a   : > { %s221_s15 = scalar_lea.vmem [#allocation8], %s1680_s28  ;;  %p3163_p1 = scmp.lt.s32.totalorder %s2417_s30, 24 }
  0x6b   : > { %s3161_s25 = scalar_select %p2712_p7, 1, 0 }
  0x6c   : > { %s229_s0 = sshll.u32 %s221_s15, 4  ;;  %p2723_p2 = pnand %p3163_p1, %p2696_p0  ;;  %s230_s0 = int_to_ptr.vmem [resolvable:$true] %s229_s0 }
  0x6d   : > { %s2210_s26 = scalar_lea.vmem %s230_s0, 32  ;;  %s2425_s12 = smov [#allocation8]  }
  0x6e   : > { %p2199_p9 = pneg %p2723_p2  ;;  %p2211_p6 = scmp.ne.s32.totalorder %s230_s0, %s2210_s26 }
  0x6f   : > { %s227_s5 = scalar_lea.hbm %s3162_s3, %s1794_s1  ;;  %s2215_s8 = sshll.u32 %s2425_s12, 4  ;;  %s2216_s8 = int_to_ptr.vmem [resolvable:$false] %s2215_s8 }
  0x70   : > { %p2213_p11 = pnand %p2211_p6, %p2199_p9  ;;  %s2217_s7 = scalar_lea.vmem %s2216_s8, 64 }
  0x71   : > { %p2218_p4 = scmp.lt.s32.totalorder %s230_s0, %s2216_s8  ;;  %p2219_p8 = scmp.lt.s32.totalorder %s2217_s7, %s2210_s26 }
  0x72   : > { %p2214_p12 = pneg %p2213_p11 }
  0x73   : > { %p2220_p7 = por %p2219_p8, %p2218_p4 }
  0x75   : > { %p2221_p5 = pnand %p2220_p7, %p2214_p12 }
  0x77   : > { %2224 = shalt.err (!%p2221_p5)
}
  0x78   : > { %s3165_s10 = sld [smem:[#allocation28_spill]]  ;;  %s240_s28 = sand.u32 (!%p2611_p10), 1, %s2385_s22  }
  0x79   : > { %s1684_s1 = sshll.u32 (!%p2611_p10), %s240_s28, 8  ;;  %s241_s13 = scalar_lea.sflag (!%p2611_p10), [#allocation4], %s240_s28 }
  0x7a   : > { %238 = sbr.rel (%p2611_p10) target bundleno = 579 (0x243), region = 32  ;;  %s2735_s4 = scalar_lea.vmem (!%p2611_p10), [#allocation3], %s1684_s1 }
  0x7e   : > { %1878 = dma.hbm_to_vmem [thread:$0]  (!%p2723_p2), %s227_s5, 32, %s230_s0, %s3165_s10  }
  0x7f   : > { %2328 = dma.done.wait (%p2673_p3), %s241_s13, 4096  }
  0x80   : > { %2330 = vsyncadd (%p2673_p3), %s241_s13, 4294963200  ;;  %s249_s9 = sand.u32 1, %s2664_s6   ;;  %s251_s0 = sand.u32 1, %s2373_s19  }
  0x81   : > { %s1685_s3 = sshll.u32 %s251_s0, 8  ;;  %s250_s5 = scalar_lea.sflag [#allocation7], %s249_s9 }
  0x82   : > { %s2743_s15 = scalar_lea.vmem [#allocation6], %s1685_s3  ;;  %p3167_p10 = scmp.ne.s32.totalorder %s3156_s20, 0 }
  0x84   : > { %2332 = dma.done.wait (%p3167_p10), %s250_s5, 4096  }
  0x85   : > { %2334 = vsyncadd (%p3167_p10), %s250_s5, 4294963200  ;;  %s3168_s26 = sld [smem:[#allocation17_spill]] }
  0x8b   : > { %s260_s12 = sand.u32 1, %s3168_s26  }
  0x8c   : > { %s2750_s8 = sshll.u32 %s260_s12, 1 }
  0x8d   : > { %s262_s24 = scalar_lea.vmem [#allocation8], %s2750_s8 }
  0x8e   : > { %2336 = dma.done.wait (%p2700_p13), %s250_s5, 32  }
  0x8f   : > { %2338 = vsyncadd (%p2700_p13), %s250_s5, 4294967264  ;;  %s3169_s6 = sld [smem:[#allocation15_spill]] }
  0x90   : > { %s3170_s20 = sld [smem:[#allocation20_spill]] }
  0x95   : > { %s292_s7 = sand.u32 1, %s3169_s6  }
  0x96   : > { %s1687_s10 = sshll.u32 %s292_s7, 8  ;;  %p1688_p3 = scmp.ne.s32.totalorder %s3170_s20, 0 }
  0x97   : > { %s2760_s18 = scalar_lea.vmem [#allocation9], %s1687_s10 }
  0x98   : > { %305 = sbr.rel (%p1688_p3) target bundleno = 190 (0xbe), region = 48 }
  0x9d   : > { %v2426_v0 = vmov 0.0  }
  0x9e   : > { %306 = vst [vmem:[#allocation2 + $0xb0] sm:$0xff] %v2426_v0  ;;  %307 = vst [vmem:[#allocation2 + $0x1b0] sm:$0xff] %v2426_v0 }
  0x9f   : > { %308 = vst [vmem:[#allocation2 + $0xd8] sm:$0xff] %v2426_v0  ;;  %309 = vst [vmem:[#allocation2 + $0x18] sm:$0xff] %v2426_v0 }
  0xa0   : > { %310 = vst [vmem:[#allocation2 + $0x50] sm:$0xff] %v2426_v0  ;;  %311 = vst [vmem:[#allocation2 + $0x168] sm:$0xff] %v2426_v0 }
  0xa1   : > { %312 = vst [vmem:[#allocation2 + $0x130] sm:$0xff] %v2426_v0  ;;  %313 = vst [vmem:[#allocation2 + $0x48] sm:$0xff] %v2426_v0 }
  0xa2   : > { %314 = vst [vmem:[#allocation2 + $0x180] sm:$0xff] %v2426_v0  ;;  %315 = vst [vmem:[#allocation2 + $0x110] sm:$0xff] %v2426_v0 }
  0xa3   : > { %316 = vst [vmem:[#allocation2 + $0x118] sm:$0xff] %v2426_v0  ;;  %317 = vst [vmem:[#allocation2 + $0x98] sm:$0xff] %v2426_v0 }
  0xa4   : > { %318 = vst [vmem:[#allocation2 + $0x120] sm:$0xff] %v2426_v0  ;;  %319 = vst [vmem:[#allocation2 + $0x150] sm:$0xff] %v2426_v0 }
  0xa5   : > { %320 = vst [vmem:[#allocation2 + $0x108] sm:$0xff] %v2426_v0  ;;  %321 = vst [vmem:[#allocation2 + $0x60] sm:$0xff] %v2426_v0 }
  0xa6   : > { %322 = vst [vmem:[#allocation2 + $0xe0] sm:$0xff] %v2426_v0  ;;  %323 = vst [vmem:[#allocation2 + $0x188] sm:$0xff] %v2426_v0 }
  0xa7   : > { %324 = vst [vmem:[#allocation2 + $0x138] sm:$0xff] %v2426_v0  ;;  %325 = vst [vmem:[#allocation2 + $0x140] sm:$0xff] %v2426_v0 }
  0xa8   : > { %326 = vst [vmem:[#allocation2 + $0x80] sm:$0xff] %v2426_v0  ;;  %327 = vst [vmem:[#allocation2 + $0x1a8] sm:$0xff] %v2426_v0 }
  0xa9   : > { %328 = vst [vmem:[#allocation2 + $0x1b8] sm:$0xff] %v2426_v0  ;;  %329 = vst [vmem:[#allocation2 + $0x28] sm:$0xff] %v2426_v0 }
  0xaa   : > { %330 = vst [vmem:[#allocation2 + $0x1e8] sm:$0xff] %v2426_v0  ;;  %331 = vst [vmem:[#allocation2 + $0xf8] sm:$0xff] %v2426_v0 }
  0xab   : > { %332 = vst [vmem:[#allocation2 + $0x160] sm:$0xff] %v2426_v0  ;;  %333 = vst [vmem:[#allocation2 + $0x30] sm:$0xff] %v2426_v0 }
  0xac   : > { %334 = vst [vmem:[#allocation2 + $0x1e0] sm:$0xff] %v2426_v0  ;;  %335 = vst [vmem:[#allocation2] sm:$0xff] %v2426_v0 }
  0xad   : > { %336 = vst [vmem:[#allocation2 + $0xf0] sm:$0xff] %v2426_v0  ;;  %337 = vst [vmem:[#allocation2 + $0x8] sm:$0xff] %v2426_v0 }
  0xae   : > { %338 = vst [vmem:[#allocation2 + $0x148] sm:$0xff] %v2426_v0  ;;  %339 = vst [vmem:[#allocation2 + $0x1d0] sm:$0xff] %v2426_v0 }
  0xaf   : > { %340 = vst [vmem:[#allocation2 + $0x100] sm:$0xff] %v2426_v0  ;;  %341 = vst [vmem:[#allocation2 + $0xc8] sm:$0xff] %v2426_v0 }
  0xb0   : > { %342 = vst [vmem:[#allocation2 + $0x40] sm:$0xff] %v2426_v0  ;;  %343 = vst [vmem:[#allocation2 + $0x1f8] sm:$0xff] %v2426_v0 }
  0xb1   : > { %344 = vst [vmem:[#allocation2 + $0x20] sm:$0xff] %v2426_v0  ;;  %345 = vst [vmem:[#allocation2 + $0x128] sm:$0xff] %v2426_v0 }
  0xb2   : > { %346 = vst [vmem:[#allocation2 + $0x1a0] sm:$0xff] %v2426_v0  ;;  %347 = vst [vmem:[#allocation2 + $0x1f0] sm:$0xff] %v2426_v0 }
  0xb3   : > { %348 = vst [vmem:[#allocation2 + $0xe8] sm:$0xff] %v2426_v0  ;;  %349 = vst [vmem:[#allocation2 + $0x78] sm:$0xff] %v2426_v0 }
  0xb4   : > { %350 = vst [vmem:[#allocation2 + $0x70] sm:$0xff] %v2426_v0  ;;  %351 = vst [vmem:[#allocation2 + $0x90] sm:$0xff] %v2426_v0 }
  0xb5   : > { %352 = vst [vmem:[#allocation2 + $0x1d8] sm:$0xff] %v2426_v0  ;;  %353 = vst [vmem:[#allocation2 + $0xd0] sm:$0xff] %v2426_v0 }
  0xb6   : > { %354 = vst [vmem:[#allocation2 + $0xb8] sm:$0xff] %v2426_v0  ;;  %355 = vst [vmem:[#allocation2 + $0x88] sm:$0xff] %v2426_v0 }
  0xb7   : > { %356 = vst [vmem:[#allocation2 + $0xa8] sm:$0xff] %v2426_v0  ;;  %357 = vst [vmem:[#allocation2 + $0x1c8] sm:$0xff] %v2426_v0 }
  0xb8   : > { %358 = vst [vmem:[#allocation2 + $0x170] sm:$0xff] %v2426_v0  ;;  %359 = vst [vmem:[#allocation2 + $0x178] sm:$0xff] %v2426_v0 }
  0xb9   : > { %360 = vst [vmem:[#allocation2 + $0x68] sm:$0xff] %v2426_v0  ;;  %361 = vst [vmem:[#allocation2 + $0x190] sm:$0xff] %v2426_v0 }
  0xba   : > { %362 = vst [vmem:[#allocation2 + $0x198] sm:$0xff] %v2426_v0  ;;  %363 = vst [vmem:[#allocation2 + $0x38] sm:$0xff] %v2426_v0 }
  0xbb   : > { %364 = vst [vmem:[#allocation2 + $0xc0] sm:$0xff] %v2426_v0  ;;  %365 = vst [vmem:[#allocation2 + $0x1c0] sm:$0xff] %v2426_v0 }
  0xbc   : > { %366 = vst [vmem:[#allocation2 + $0x158] sm:$0xff] %v2426_v0  ;;  %367 = vst [vmem:[#allocation2 + $0x10] sm:$0xff] %v2426_v0 }
  0xbd   : > { %368 = vst [vmem:[#allocation2 + $0x58] sm:$0xff] %v2426_v0  ;;  %369 = vst [vmem:[#allocation2 + $0xa0] sm:$0xff] %v2426_v0 }
  0xbe PF: > { %v2045_v1 = vld [vmem:[%s2743_s15 + $0x74] ss:$8 sps:$4 sm:$0xff]   ;;  %v2047_v2 = vld [vmem:[%s2743_s15 + $0x70] ss:$8 sps:$4 sm:$0xff]   ;;  %v2048_v3 = vld [vmem:[%s2743_s15 + $0x64] ss:$8 sps:$4 sm:$0xff]  }
  0xbf   : > { %818 = vmatprep.subr.bf16.mxu0 %v2045_v1  ;;  %1827 = vmatprep.subr.bf16.mxu1 %v2045_v1  ;;  %v2050_v4 = vld [vmem:[%s2743_s15 + $0x60] ss:$8 sps:$4 sm:$0xff]   ;;  %v2051_v5 = vld [vmem:[%s2743_s15 + $0x54] ss:$8 sps:$4 sm:$0xff]   ;;  %v2053_v6 = vld [vmem:[%s2743_s15 + $0x50] ss:$8 sps:$4 sm:$0xff]  }
  0xc0   : > { %819 = vmatpush1.bf16.msra.mxu0 %v2047_v2  ;;  %1843 = vmatpush1.bf16.msra.mxu1 %v2047_v2  ;;  %v2054_v7 = vld [vmem:[%s2743_s15 + $0x44] ss:$8 sps:$4 sm:$0xff]   ;;  %v2056_v8 = vld [vmem:[%s2743_s15 + $0x40] ss:$8 sps:$4 sm:$0xff]   ;;  %v2057_v9 = vld [vmem:[%s2743_s15 + $0x34] ss:$8 sps:$4 sm:$0xff]  }
  0xc1   : > { %820 = vmatprep.subr.bf16.mxu0 %v2048_v3  ;;  %1828 = vmatprep.subr.bf16.mxu1 %v2048_v3  ;;  %v2059_v10 = vld [vmem:[%s2743_s15 + $0x30] ss:$8 sps:$4 sm:$0xff]   ;;  %v2060_v11 = vld [vmem:[%s2743_s15 + $0x24] ss:$8 sps:$4 sm:$0xff]   ;;  %v2062_v12 = vld [vmem:[%s2743_s15 + $0x20] ss:$8 sps:$4 sm:$0xff]  }
  0xc2   : > { %v2063_v13 = vld [vmem:[%s2743_s15 + $0x14] ss:$8 sps:$4 sm:$0xff]   ;;  %v2095_v14 = vld [vmem:[%s2735_s4 + $0x4] ss:$8 sps:$4 sm:$0xff]   ;;  %v2065_v15 = vld [vmem:[%s2743_s15 + $0x10] ss:$8 sps:$4 sm:$0xff]  }
  0xc3   : > { %v2098_v16 = vld [vmem:[%s2735_s4 + $0x84] ss:$8 sps:$4 sm:$0xff]   ;;  %850 = vmatprep.mubr.bf16.mxu0 %v2095_v14  ;;  %v2068_v18 = vld [vmem:[%s2743_s15] ss:$8 sps:$4 sm:$0xff]   ;;  %v2069_v19 = vld [vmem:[%s2743_s15 + $0xf4] ss:$8 sps:$4 sm:$0xff]  }
  0xc4   : > { %821 = vmatpush1.bf16.msra.mxu0 %v2050_v4  ;;  %1844 = vmatpush1.bf16.msra.mxu1 %v2050_v4  ;;  %v2066_v17 = vld [vmem:[%s2743_s15 + $0x4] ss:$8 sps:$4 sm:$0xff]   ;;  %v2071_v20 = vld [vmem:[%s2743_s15 + $0xf0] ss:$8 sps:$4 sm:$0xff]   ;;  %v2074_v22 = vld [vmem:[%s2743_s15 + $0xe0] ss:$8 sps:$4 sm:$0xff]  }
  0xc5   : > { %822 = vmatprep.subr.bf16.mxu0 %v2051_v5  ;;  %1829 = vmatprep.subr.bf16.mxu1 %v2051_v5  ;;  %v2072_v21 = vld [vmem:[%s2743_s15 + $0xe4] ss:$8 sps:$4 sm:$0xff]   ;;  %v2075_v23 = vld [vmem:[%s2743_s15 + $0xd4] ss:$8 sps:$4 sm:$0xff]   ;;  %v2077_v24 = vld [vmem:[%s2743_s15 + $0xd0] ss:$8 sps:$4 sm:$0xff]  }
  0xc6   : > { %930 = vmatprep.mubr.bf16.mxu1 %v2098_v16  ;;  %v2078_v25 = vld [vmem:[%s2743_s15 + $0xc4] ss:$8 sps:$4 sm:$0xff]   ;;  %v2080_v26 = vld [vmem:[%s2743_s15 + $0xc0] ss:$8 sps:$4 sm:$0xff]   ;;  %v2081_v27 = vld [vmem:[%s2743_s15 + $0xb4] ss:$8 sps:$4 sm:$0xff]  }
  0xc7   : > { %v2083_v28 = vld [vmem:[%s2743_s15 + $0xb0] ss:$8 sps:$4 sm:$0xff]   ;;  %v2084_v29 = vld [vmem:[%s2743_s15 + $0xa4] ss:$8 sps:$4 sm:$0xff]   ;;  %v2086_v30 = vld [vmem:[%s2743_s15 + $0xa0] ss:$8 sps:$4 sm:$0xff]  }
  0xc8   : > { %823 = vmatpush1.bf16.msra.mxu0 %v2053_v6  ;;  %1845 = vmatpush1.bf16.msra.mxu1 %v2053_v6  ;;  %v2087_v31 = vld [vmem:[%s2743_s15 + $0x94] ss:$8 sps:$4 sm:$0xff]   ;;  %v2089_v32 = vld [vmem:[%s2743_s15 + $0x90] ss:$8 sps:$4 sm:$0xff]   ;;  %v2090_v33 = vld [vmem:[%s2743_s15 + $0x84] ss:$8 sps:$4 sm:$0xff]  }
  0xc9   : > { %824 = vmatprep.subr.bf16.mxu0 %v2054_v7  ;;  %1830 = vmatprep.subr.bf16.mxu1 %v2054_v7  ;;  %v2092_v34 = vld [vmem:[%s2743_s15 + $0x80] ss:$8 sps:$4 sm:$0xff]   ;;  %v2099_v37 = vld [vmem:[%s2735_s4 + $0x14] ss:$8 sps:$4 sm:$0xff]   ;;  %v2103_v39 = vld [vmem:[%s2735_s4 + $0x10] ss:$8 sps:$4 sm:$0xff]  }
  0xca   : > { %v2093_v35 = vld [vmem:[%s2735_s4] ss:$8 sps:$4 sm:$0xff]   ;;  %v2101_v38 = vld [vmem:[%s2735_s4 + $0x94] ss:$8 sps:$4 sm:$0xff]   ;;  %v2104_v40 = vld [vmem:[%s2735_s4 + $0x90] ss:$8 sps:$4 sm:$0xff]  }
  0xcb   : > { %v2096_v36 = vld [vmem:[%s2735_s4 + $0x80] ss:$8 sps:$4 sm:$0xff]   ;;  %v2105_v41 = vld [vmem:[%s2735_s4 + $0x24] ss:$8 sps:$4 sm:$0xff]   ;;  %v2111_v45 = vld [vmem:[%s2735_s4 + $0x34] ss:$8 sps:$4 sm:$0xff]  }
  0xcc   : > { %825 = vmatpush1.bf16.msra.mxu0 %v2056_v8  ;;  %1846 = vmatpush1.bf16.msra.mxu1 %v2056_v8  ;;  %v2107_v42 = vld [vmem:[%s2735_s4 + $0xa4] ss:$8 sps:$4 sm:$0xff]   ;;  %v2109_v43 = vld [vmem:[%s2735_s4 + $0x20] ss:$8 sps:$4 sm:$0xff]   ;;  %v2113_v46 = vld [vmem:[%s2735_s4 + $0xb4] ss:$8 sps:$4 sm:$0xff]  }
  0xcd   : > { %826 = vmatprep.subr.bf16.mxu0 %v2057_v9  ;;  %1831 = vmatprep.subr.bf16.mxu1 %v2057_v9  ;;  %v2110_v44 = vld [vmem:[%s2735_s4 + $0xa0] ss:$8 sps:$4 sm:$0xff]   ;;  %v2115_v47 = vld [vmem:[%s2735_s4 + $0x30] ss:$8 sps:$4 sm:$0xff]   ;;  %v2117_v49 = vld [vmem:[%s2735_s4 + $0x44] ss:$8 sps:$4 sm:$0xff]  }
  0xce   : > { %v2116_v48 = vld [vmem:[%s2735_s4 + $0xb0] ss:$8 sps:$4 sm:$0xff]   ;;  %v2119_v50 = vld [vmem:[%s2735_s4 + $0xc4] ss:$8 sps:$4 sm:$0xff]   ;;  %v2121_v51 = vld [vmem:[%s2735_s4 + $0x40] ss:$8 sps:$4 sm:$0xff]  }
  0xcf   : > { %v2122_v52 = vld [vmem:[%s2735_s4 + $0xc0] ss:$8 sps:$4 sm:$0xff]   ;;  %v2123_v53 = vld [vmem:[%s2735_s4 + $0x54] ss:$8 sps:$4 sm:$0xff]   ;;  %v2127_v55 = vld [vmem:[%s2735_s4 + $0x50] ss:$8 sps:$4 sm:$0xff]  }
  0xd0   : > { %827 = vmatpush1.bf16.msra.mxu0 %v2059_v10  ;;  %1847 = vmatpush1.bf16.msra.mxu1 %v2059_v10  ;;  %v2125_v54 = vld [vmem:[%s2735_s4 + $0xd4] ss:$8 sps:$4 sm:$0xff]   ;;  %v2128_v56 = vld [vmem:[%s2735_s4 + $0xd0] ss:$8 sps:$4 sm:$0xff]   ;;  %v2129_v57 = vld [vmem:[%s2735_s4 + $0x64] ss:$8 sps:$4 sm:$0xff]  }
  0xd1   : > { %828 = vmatprep.subr.bf16.mxu0 %v2060_v11  ;;  %1832 = vmatprep.subr.bf16.mxu1 %v2060_v11  ;;  %v2131_v58 = vld [vmem:[%s2735_s4 + $0xe4] ss:$8 sps:$4 sm:$0xff]   ;;  %v2133_v59 = vld [vmem:[%s2735_s4 + $0x60] ss:$8 sps:$4 sm:$0xff]   ;;  %v2135_v61 = vld [vmem:[%s2735_s4 + $0x74] ss:$8 sps:$4 sm:$0xff]  }
  0xd2   : > { %v2134_v60 = vld [vmem:[%s2735_s4 + $0xe0] ss:$8 sps:$4 sm:$0xff]   ;;  %v2137_v62 = vld [vmem:[%s2735_s4 + $0xf4] ss:$8 sps:$4 sm:$0xff]   ;;  %v2139_v63 = vld [vmem:[%s2735_s4 + $0x70] ss:$8 sps:$4 sm:$0xff]  }
  0xd3   : > { %v2140_v0 = vld [vmem:[%s2735_s4 + $0xf0] ss:$8 sps:$4 sm:$0xff]   ;;  %v402_v2 = vld [vmem:[#allocation2 + $0x148] sm:$0xff]  ;;  %s3171_s21 = sld [smem:[#allocation20_spill]] }
  0xd4   : > { %829 = vmatpush1.bf16.msra.mxu0 %v2062_v12  ;;  %1848 = vmatpush1.bf16.msra.mxu1 %v2062_v12  ;;  %v370_v1 = vld [vmem:[#allocation2 + $0xb0] sm:$0xff]  ;;  %v372_v11 = vld [vmem:[#allocation2 + $0xd8] sm:$0xff]  ;;  %v404_v12 = vld [vmem:[#allocation2 + $0x100] sm:$0xff] }
  0xd5   : > { %830 = vmatprep.subr.bf16.mxu0 %v2063_v13  ;;  %1833 = vmatprep.subr.bf16.mxu1 %v2063_v13  ;;  %v371_v5 = vld [vmem:[#allocation2 + $0x1b0] sm:$0xff] }
  0xd6   : > { %v403_v6 = vld [vmem:[#allocation2 + $0x1d0] sm:$0xff] }
  0xd8   : > { %831 = vmatpush1.bf16.msra.mxu0 %v2065_v15  ;;  %1849 = vmatpush1.bf16.msra.mxu1 %v2065_v15 }
  0xd9   : > { %832 = vmatprep.subr.bf16.mxu0 %v2066_v17  ;;  %1834 = vmatprep.subr.bf16.mxu1 %v2066_v17  ;;  %v373_v17 = vld [vmem:[#allocation2 + $0x18] sm:$0xff]  ;;  %p1753_p7 = scmp.ne.s32.totalorder %s3171_s21, 1 }
  0xdc   : > { %833 = vmatpush1.bf16.msra.mxu0 %v2068_v18  ;;  %1850 = vmatpush1.bf16.msra.mxu1 %v2068_v18  ;;  %v405_v18 = vld [vmem:[#allocation2 + $0xc8] sm:$0xff] }
  0xdd   : > { %834 = vmatprep.subr.bf16.mxu0 %v2069_v19  ;;  %1835 = vmatprep.subr.bf16.mxu1 %v2069_v19 }
  0xe0   : > { %835 = vmatpush2.bf16.msra.mxu0 %v2071_v20  ;;  %1851 = vmatpush2.bf16.msra.mxu1 %v2071_v20 }
  0xe1   : > { %836 = vmatprep.subr.bf16.mxu0 %v2072_v21  ;;  %1836 = vmatprep.subr.bf16.mxu1 %v2072_v21 }
  0xe4   : > { %837 = vmatpush2.bf16.msra.mxu0 %v2074_v22  ;;  %1852 = vmatpush2.bf16.msra.mxu1 %v2074_v22 }
  0xe5   : > { %838 = vmatprep.subr.bf16.mxu0 %v2075_v23  ;;  %1837 = vmatprep.subr.bf16.mxu1 %v2075_v23  ;;  %v374_v23 = vld [vmem:[#allocation2 + $0x50] sm:$0xff] }
  0xe8   : > { %839 = vmatpush2.bf16.msra.mxu0 %v2077_v24  ;;  %1853 = vmatpush2.bf16.msra.mxu1 %v2077_v24  ;;  %v406_v24 = vld [vmem:[#allocation2 + $0x40] sm:$0xff] }
  0xe9   : > { %840 = vmatprep.subr.bf16.mxu0 %v2078_v25  ;;  %1838 = vmatprep.subr.bf16.mxu1 %v2078_v25 }
  0xec   : > { %841 = vmatpush2.bf16.msra.mxu0 %v2080_v26  ;;  %1854 = vmatpush2.bf16.msra.mxu1 %v2080_v26 }
  0xed   : > { %842 = vmatprep.subr.bf16.mxu0 %v2081_v27  ;;  %1839 = vmatprep.subr.bf16.mxu1 %v2081_v27 }
  0xf0   : > { %843 = vmatpush2.bf16.msra.mxu0 %v2083_v28  ;;  %1855 = vmatpush2.bf16.msra.mxu1 %v2083_v28 }
  0xf1   : > { %844 = vmatprep.subr.bf16.mxu0 %v2084_v29  ;;  %1840 = vmatprep.subr.bf16.mxu1 %v2084_v29  ;;  %v375_v29 = vld [vmem:[#allocation2 + $0x168] sm:$0xff] }
  0xf4   : > { %845 = vmatpush2.bf16.msra.mxu0 %v2086_v30  ;;  %1856 = vmatpush2.bf16.msra.mxu1 %v2086_v30  ;;  %v407_v30 = vld [vmem:[#allocation2 + $0x1f8] sm:$0xff] }
  0xf5   : > { %846 = vmatprep.subr.bf16.mxu0 %v2087_v31  ;;  %1841 = vmatprep.subr.bf16.mxu1 %v2087_v31 }
  0xf8   : > { %847 = vmatpush2.bf16.msra.mxu0 %v2089_v32  ;;  %1857 = vmatpush2.bf16.msra.mxu1 %v2089_v32 }
  0xf9   : > { %848 = vmatprep.subr.bf16.mxu0 %v2090_v33  ;;  %1842 = vmatprep.subr.bf16.mxu1 %v2090_v33 }
  0xfc   : > { %849 = vmatpush2.bf16.msra.mxu0 %v2092_v34  ;;  %1858 = vmatpush2.bf16.msra.mxu1 %v2092_v34 }
  0xff   : > { %851 = vmatmul.mubr.bf16.vlgmr.msra.gmra.mxu0 %v2093_v35  ;;  %931 = vmatmul.mubr.bf16.vlgmr.msra.gmra.mxu1 %v2096_v36  ;;  %v376_v35 = vld [vmem:[#allocation2 + $0x130] sm:$0xff]  ;;  %v408_v36 = vld [vmem:[#allocation2 + $0x20] sm:$0xff] }
 0x100   : > { %860 = vmatprep.mubr.bf16.mxu0 %v2099_v37  ;;  %940 = vmatprep.mubr.bf16.mxu1 %v2101_v38 }
 0x107   : > { %861 = vmatmul.mubr.bf16.gmra.mxu0 %v2103_v39  ;;  %941 = vmatmul.mubr.bf16.gmra.mxu1 %v2104_v40 }
 0x108   : > { %870 = vmatprep.mubr.bf16.mxu0 %v2105_v41  ;;  %950 = vmatprep.mubr.bf16.mxu1 %v2107_v42  ;;  %v377_v41 = vld [vmem:[#allocation2 + $0x48] sm:$0xff] }
 0x109   : > { %v409_v42 = vld [vmem:[#allocation2 + $0x128] sm:$0xff] }
 0x10f   : > { %871 = vmatmul.mubr.bf16.gmra.mxu0 %v2109_v43  ;;  %951 = vmatmul.mubr.bf16.gmra.mxu1 %v2110_v44 }
 0x110   : > { %880 = vmatprep.mubr.bf16.mxu0 %v2111_v45  ;;  %960 = vmatprep.mubr.bf16.mxu1 %v2113_v46 }
 0x117   : > { %881 = vmatmul.mubr.bf16.gmra.mxu0 %v2115_v47  ;;  %961 = vmatmul.mubr.bf16.gmra.mxu1 %v2116_v48  ;;  %v378_v47 = vld [vmem:[#allocation2 + $0x180] sm:$0xff] }
 0x118   : > { %890 = vmatprep.mubr.bf16.mxu0 %v2117_v49  ;;  %970 = vmatprep.mubr.bf16.mxu1 %v2119_v50  ;;  %v410_v48 = vld [vmem:[#allocation2 + $0x1a0] sm:$0xff] }
 0x11f   : > { %891 = vmatmul.mubr.bf16.gmra.mxu0 %v2121_v51  ;;  %971 = vmatmul.mubr.bf16.gmra.mxu1 %v2122_v52 }
 0x120   : > { %900 = vmatprep.mubr.bf16.mxu0 %v2123_v53  ;;  %980 = vmatprep.mubr.bf16.mxu1 %v2125_v54  ;;  %v379_v53 = vld [vmem:[#allocation2 + $0x110] sm:$0xff] }
 0x121   : > { %v411_v54 = vld [vmem:[#allocation2 + $0x1f0] sm:$0xff] }
 0x127   : > { %901 = vmatmul.mubr.bf16.gmra.mxu0 %v2127_v55  ;;  %981 = vmatmul.mubr.bf16.gmra.mxu1 %v2128_v56 }
 0x128   : > { %910 = vmatprep.mubr.bf16.mxu0 %v2129_v57  ;;  %990 = vmatprep.mubr.bf16.mxu1 %v2131_v58 }
 0x12f   : > { %911 = vmatmul.mubr.bf16.gmra.mxu0 %v2133_v59  ;;  %991 = vmatmul.mubr.bf16.gmra.mxu1 %v2134_v60  ;;  %v380_v59 = vld [vmem:[#allocation2 + $0x118] sm:$0xff]  ;;  %v412_v60 = vld [vmem:[#allocation2 + $0xe8] sm:$0xff] }
 0x130   : > { %920 = vmatprep.mubr.bf16.mxu0 %v2135_v61  ;;  %1000 = vmatprep.mubr.bf16.mxu1 %v2137_v62 }
 0x137   : > { %921 = vmatmul.mubr.bf16.gmra.mxu0 %v2139_v63  ;;  %1001 = vmatmul.mubr.bf16.gmra.mxu1 %v2140_v0 }
 0x1bf   : > { %v852_v3 = vpop.f32.mrf.mxu0  ;;  %v932_v4 = vpop.f32.mrf.mxu1 }
 0x1c0   : > { %v1011_v7 = vadd.f32 %v852_v3, %v370_v1  ;;  %v1043_v8 = vadd.f32 %v932_v4, %v402_v2  ;;  %v381_v1 = vld [vmem:[#allocation2 + $0x98] sm:$0xff] }
 0x1c1   : > { %v854_v9 = vpop.f32.mrf.mxu0  ;;  %v934_v10 = vpop.f32.mrf.mxu1  ;;  %v413_v2 = vld [vmem:[#allocation2 + $0x78] sm:$0xff] }
 0x1c2   : > { %1075 = vst [vmem:[#allocation2 + $0xb0] sm:$0xff] %v1011_v7  ;;  %1107 = vst [vmem:[#allocation2 + $0x148] sm:$0xff] %v1043_v8  ;;  %v1012_v13 = vadd.f32 %v854_v9, %v371_v5  ;;  %v1044_v14 = vadd.f32 %v934_v10, %v403_v6  ;;  %v382_v7 = vld [vmem:[#allocation2 + $0x120] sm:$0xff]  ;;  %v414_v8 = vld [vmem:[#allocation2 + $0x70] sm:$0xff] }
 0x1c3   : > { %v856_v15 = vpop.f32.mrf.mxu0  ;;  %v936_v16 = vpop.f32.mrf.mxu1 }
 0x1c4   : > { %1076 = vst [vmem:[#allocation2 + $0x1b0] sm:$0xff] %v1012_v13  ;;  %1108 = vst [vmem:[#allocation2 + $0x1d0] sm:$0xff] %v1044_v14  ;;  %v1013_v19 = vadd.f32 %v856_v15, %v372_v11  ;;  %v1045_v20 = vadd.f32 %v936_v16, %v404_v12  ;;  %v383_v13 = vld [vmem:[#allocation2 + $0x150] sm:$0xff] }
 0x1c5   : > { %v858_v21 = vpop.f32.mrf.mxu0  ;;  %v938_v22 = vpop.f32.mrf.mxu1  ;;  %v415_v14 = vld [vmem:[#allocation2 + $0x90] sm:$0xff] }
 0x1c6   : > { %1077 = vst [vmem:[#allocation2 + $0xd8] sm:$0xff] %v1013_v19  ;;  %1109 = vst [vmem:[#allocation2 + $0x100] sm:$0xff] %v1045_v20  ;;  %v1014_v25 = vadd.f32 %v858_v21, %v373_v17  ;;  %v1046_v26 = vadd.f32 %v938_v22, %v405_v18  ;;  %v384_v19 = vld [vmem:[#allocation2 + $0x108] sm:$0xff]  ;;  %v416_v20 = vld [vmem:[#allocation2 + $0x1d8] sm:$0xff] }
 0x1c7   : > { %v862_v27 = vpop.f32.mrf.mxu0  ;;  %v942_v28 = vpop.f32.mrf.mxu1 }
 0x1c8   : > { %1078 = vst [vmem:[#allocation2 + $0x18] sm:$0xff] %v1014_v25  ;;  %1110 = vst [vmem:[#allocation2 + $0xc8] sm:$0xff] %v1046_v26  ;;  %v1015_v31 = vadd.f32 %v862_v27, %v374_v23  ;;  %v1047_v32 = vadd.f32 %v942_v28, %v406_v24  ;;  %v385_v25 = vld [vmem:[#allocation2 + $0x60] sm:$0xff]  ;;  %v417_v26 = vld [vmem:[#allocation2 + $0xd0] sm:$0xff] }
 0x1c9   : > { %v864_v33 = vpop.f32.mrf.mxu0  ;;  %v944_v34 = vpop.f32.mrf.mxu1 }
 0x1ca   : > { %1079 = vst [vmem:[#allocation2 + $0x50] sm:$0xff] %v1015_v31  ;;  %1111 = vst [vmem:[#allocation2 + $0x40] sm:$0xff] %v1047_v32  ;;  %v1016_v37 = vadd.f32 %v864_v33, %v375_v29  ;;  %v1048_v38 = vadd.f32 %v944_v34, %v407_v30  ;;  %v386_v31 = vld [vmem:[#allocation2 + $0xe0] sm:$0xff]  ;;  %v418_v32 = vld [vmem:[#allocation2 + $0xb8] sm:$0xff] }
 0x1cb   : > { %v866_v39 = vpop.f32.mrf.mxu0  ;;  %v946_v40 = vpop.f32.mrf.mxu1 }
 0x1cc   : > { %1080 = vst [vmem:[#allocation2 + $0x168] sm:$0xff] %v1016_v37  ;;  %1112 = vst [vmem:[#allocation2 + $0x1f8] sm:$0xff] %v1048_v38  ;;  %v1017_v43 = vadd.f32 %v866_v39, %v376_v35  ;;  %v1049_v44 = vadd.f32 %v946_v40, %v408_v36  ;;  %v387_v37 = vld [vmem:[#allocation2 + $0x188] sm:$0xff] }
 0x1cd   : > { %v868_v45 = vpop.f32.mrf.mxu0  ;;  %v948_v46 = vpop.f32.mrf.mxu1  ;;  %v419_v38 = vld [vmem:[#allocation2 + $0x88] sm:$0xff] }
 0x1ce   : > { %1081 = vst [vmem:[#allocation2 + $0x130] sm:$0xff] %v1017_v43  ;;  %1113 = vst [vmem:[#allocation2 + $0x20] sm:$0xff] %v1049_v44  ;;  %v1018_v49 = vadd.f32 %v868_v45, %v377_v41  ;;  %v1050_v50 = vadd.f32 %v948_v46, %v409_v42  ;;  %v388_v43 = vld [vmem:[#allocation2 + $0x138] sm:$0xff]  ;;  %v420_v44 = vld [vmem:[#allocation2 + $0xa8] sm:$0xff] }
 0x1cf   : > { %v872_v51 = vpop.f32.mrf.mxu0  ;;  %v952_v52 = vpop.f32.mrf.mxu1 }
 0x1d0   : > { %1082 = vst [vmem:[#allocation2 + $0x48] sm:$0xff] %v1018_v49  ;;  %1114 = vst [vmem:[#allocation2 + $0x128] sm:$0xff] %v1050_v50  ;;  %v1019_v55 = vadd.f32 %v872_v51, %v378_v47  ;;  %v1051_v56 = vadd.f32 %v952_v52, %v410_v48  ;;  %v389_v49 = vld [vmem:[#allocation2 + $0x140] sm:$0xff]  ;;  %v421_v50 = vld [vmem:[#allocation2 + $0x1c8] sm:$0xff] }
 0x1d1   : > { %v874_v57 = vpop.f32.mrf.mxu0  ;;  %v954_v58 = vpop.f32.mrf.mxu1 }
 0x1d2   : > { %1083 = vst [vmem:[#allocation2 + $0x180] sm:$0xff] %v1019_v55  ;;  %1115 = vst [vmem:[#allocation2 + $0x1a0] sm:$0xff] %v1051_v56  ;;  %v1020_v61 = vadd.f32 %v874_v57, %v379_v53  ;;  %v1052_v62 = vadd.f32 %v954_v58, %v411_v54  ;;  %v390_v55 = vld [vmem:[#allocation2 + $0x80] sm:$0xff]  ;;  %v422_v56 = vld [vmem:[#allocation2 + $0x170] sm:$0xff] }
 0x1d3   : > { %v876_v63 = vpop.f32.mrf.mxu0  ;;  %v956_v0 = vpop.f32.mrf.mxu1 }
 0x1d4   : > { %1084 = vst [vmem:[#allocation2 + $0x110] sm:$0xff] %v1020_v61  ;;  %1116 = vst [vmem:[#allocation2 + $0x1f0] sm:$0xff] %v1052_v62  ;;  %v1021_v3 = vadd.f32 %v876_v63, %v380_v59  ;;  %v1053_v4 = vadd.f32 %v956_v0, %v412_v60  ;;  %v391_v61 = vld [vmem:[#allocation2 + $0x1a8] sm:$0xff]  ;;  %v423_v62 = vld [vmem:[#allocation2 + $0x178] sm:$0xff] }
 0x1d5   : > { %v878_v5 = vpop.f32.mrf.mxu0  ;;  %v958_v6 = vpop.f32.mrf.mxu1 }
 0x1d6   : > { %1085 = vst [vmem:[#allocation2 + $0x118] sm:$0xff] %v1021_v3  ;;  %1117 = vst [vmem:[#allocation2 + $0xe8] sm:$0xff] %v1053_v4  ;;  %v1022_v9 = vadd.f32 %v878_v5, %v381_v1  ;;  %v1054_v10 = vadd.f32 %v958_v6, %v413_v2  ;;  %v392_v3 = vld [vmem:[#allocation2 + $0x1b8] sm:$0xff]  ;;  %v424_v4 = vld [vmem:[#allocation2 + $0x68] sm:$0xff] }
 0x1d7   : > { %v882_v11 = vpop.f32.mrf.mxu0  ;;  %v962_v12 = vpop.f32.mrf.mxu1 }
 0x1d8   : > { %1086 = vst [vmem:[#allocation2 + $0x98] sm:$0xff] %v1022_v9  ;;  %1118 = vst [vmem:[#allocation2 + $0x78] sm:$0xff] %v1054_v10  ;;  %v1023_v15 = vadd.f32 %v882_v11, %v382_v7  ;;  %v1055_v16 = vadd.f32 %v962_v12, %v414_v8  ;;  %v393_v9 = vld [vmem:[#allocation2 + $0x28] sm:$0xff]  ;;  %v425_v10 = vld [vmem:[#allocation2 + $0x190] sm:$0xff] }
 0x1d9   : > { %v884_v17 = vpop.f32.mrf.mxu0  ;;  %v964_v18 = vpop.f32.mrf.mxu1 }
 0x1da   : > { %1087 = vst [vmem:[#allocation2 + $0x120] sm:$0xff] %v1023_v15  ;;  %1119 = vst [vmem:[#allocation2 + $0x70] sm:$0xff] %v1055_v16  ;;  %v1024_v21 = vadd.f32 %v884_v17, %v383_v13  ;;  %v1056_v22 = vadd.f32 %v964_v18, %v415_v14  ;;  %v394_v15 = vld [vmem:[#allocation2 + $0x1e8] sm:$0xff]  ;;  %v426_v16 = vld [vmem:[#allocation2 + $0x198] sm:$0xff] }
 0x1db   : > { %v886_v23 = vpop.f32.mrf.mxu0  ;;  %v966_v24 = vpop.f32.mrf.mxu1 }
 0x1dc   : > { %1088 = vst [vmem:[#allocation2 + $0x150] sm:$0xff] %v1024_v21  ;;  %1120 = vst [vmem:[#allocation2 + $0x90] sm:$0xff] %v1056_v22  ;;  %v1025_v27 = vadd.f32 %v886_v23, %v384_v19  ;;  %v1057_v28 = vadd.f32 %v966_v24, %v416_v20  ;;  %v395_v21 = vld [vmem:[#allocation2 + $0xf8] sm:$0xff] }
 0x1dd   : > { %v888_v29 = vpop.f32.mrf.mxu0  ;;  %v968_v30 = vpop.f32.mrf.mxu1  ;;  %v427_v22 = vld [vmem:[#allocation2 + $0x38] sm:$0xff] }
 0x1de   : > { %1089 = vst [vmem:[#allocation2 + $0x108] sm:$0xff] %v1025_v27  ;;  %1121 = vst [vmem:[#allocation2 + $0x1d8] sm:$0xff] %v1057_v28  ;;  %v1026_v33 = vadd.f32 %v888_v29, %v385_v25  ;;  %v1058_v34 = vadd.f32 %v968_v30, %v417_v26  ;;  %v396_v27 = vld [vmem:[#allocation2 + $0x160] sm:$0xff] }
 0x1df   : > { %v892_v35 = vpop.f32.mrf.mxu0  ;;  %v972_v36 = vpop.f32.mrf.mxu1  ;;  %v428_v28 = vld [vmem:[#allocation2 + $0xc0] sm:$0xff] }
 0x1e0   : > { %1090 = vst [vmem:[#allocation2 + $0x60] sm:$0xff] %v1026_v33  ;;  %1122 = vst [vmem:[#allocation2 + $0xd0] sm:$0xff] %v1058_v34  ;;  %v1027_v39 = vadd.f32 %v892_v35, %v386_v31  ;;  %v1059_v40 = vadd.f32 %v972_v36, %v418_v32  ;;  %v397_v33 = vld [vmem:[#allocation2 + $0x30] sm:$0xff]  ;;  %v429_v34 = vld [vmem:[#allocation2 + $0x1c0] sm:$0xff] }
 0x1e1   : > { %v894_v41 = vpop.f32.mrf.mxu0  ;;  %v974_v42 = vpop.f32.mrf.mxu1 }
 0x1e2   : > { %1091 = vst [vmem:[#allocation2 + $0xe0] sm:$0xff] %v1027_v39  ;;  %1123 = vst [vmem:[#allocation2 + $0xb8] sm:$0xff] %v1059_v40  ;;  %v1028_v45 = vadd.f32 %v894_v41, %v387_v37  ;;  %v1060_v46 = vadd.f32 %v974_v42, %v419_v38  ;;  %v398_v39 = vld [vmem:[#allocation2 + $0x1e0] sm:$0xff]  ;;  %v430_v40 = vld [vmem:[#allocation2 + $0x158] sm:$0xff] }
 0x1e3   : > { %v896_v47 = vpop.f32.mrf.mxu0  ;;  %v976_v48 = vpop.f32.mrf.mxu1 }
 0x1e4   : > { %1092 = vst [vmem:[#allocation2 + $0x188] sm:$0xff] %v1028_v45  ;;  %1124 = vst [vmem:[#allocation2 + $0x88] sm:$0xff] %v1060_v46  ;;  %v1029_v51 = vadd.f32 %v896_v47, %v388_v43  ;;  %v1061_v52 = vadd.f32 %v976_v48, %v420_v44  ;;  %v399_v45 = vld [vmem:[#allocation2] sm:$0xff]  ;;  %v431_v46 = vld [vmem:[#allocation2 + $0x10] sm:$0xff] }
 0x1e5   : > { %v898_v53 = vpop.f32.mrf.mxu0  ;;  %v978_v54 = vpop.f32.mrf.mxu1 }
 0x1e6   : > { %1093 = vst [vmem:[#allocation2 + $0x138] sm:$0xff] %v1029_v51  ;;  %1125 = vst [vmem:[#allocation2 + $0xa8] sm:$0xff] %v1061_v52  ;;  %v1030_v57 = vadd.f32 %v898_v53, %v389_v49  ;;  %v1062_v58 = vadd.f32 %v978_v54, %v421_v50  ;;  %v400_v51 = vld [vmem:[#allocation2 + $0xf0] sm:$0xff]  ;;  %v432_v52 = vld [vmem:[#allocation2 + $0x58] sm:$0xff] }
 0x1e7   : > { %v902_v59 = vpop.f32.mrf.mxu0  ;;  %v982_v60 = vpop.f32.mrf.mxu1 }
 0x1e8   : > { %1094 = vst [vmem:[#allocation2 + $0x140] sm:$0xff] %v1030_v57  ;;  %1126 = vst [vmem:[#allocation2 + $0x1c8] sm:$0xff] %v1062_v58  ;;  %v1031_v63 = vadd.f32 %v902_v59, %v390_v55  ;;  %v1063_v0 = vadd.f32 %v982_v60, %v422_v56  ;;  %v401_v57 = vld [vmem:[#allocation2 + $0x8] sm:$0xff]  ;;  %v433_v58 = vld [vmem:[#allocation2 + $0xa0] sm:$0xff] }
 0x1e9   : > { %v904_v1 = vpop.f32.mrf.mxu0  ;;  %v984_v2 = vpop.f32.mrf.mxu1 }
 0x1ea   : > { %1095 = vst [vmem:[#allocation2 + $0x80] sm:$0xff] %v1031_v63  ;;  %1127 = vst [vmem:[#allocation2 + $0x170] sm:$0xff] %v1063_v0  ;;  %v1032_v5 = vadd.f32 %v904_v1, %v391_v61  ;;  %v1064_v6 = vadd.f32 %v984_v2, %v423_v62 }
 0x1eb   : > { %v906_v7 = vpop.f32.mrf.mxu0  ;;  %v986_v8 = vpop.f32.mrf.mxu1 }
 0x1ec   : > { %1096 = vst [vmem:[#allocation2 + $0x1a8] sm:$0xff] %v1032_v5  ;;  %1128 = vst [vmem:[#allocation2 + $0x178] sm:$0xff] %v1064_v6  ;;  %v1033_v11 = vadd.f32 %v906_v7, %v392_v3  ;;  %v1065_v12 = vadd.f32 %v986_v8, %v424_v4 }
 0x1ed   : > { %v908_v13 = vpop.f32.mrf.mxu0  ;;  %v988_v14 = vpop.f32.mrf.mxu1 }
 0x1ee   : > { %1097 = vst [vmem:[#allocation2 + $0x1b8] sm:$0xff] %v1033_v11  ;;  %1129 = vst [vmem:[#allocation2 + $0x68] sm:$0xff] %v1065_v12  ;;  %v1034_v17 = vadd.f32 %v908_v13, %v393_v9  ;;  %v1066_v18 = vadd.f32 %v988_v14, %v425_v10 }
 0x1ef   : > { %v912_v19 = vpop.f32.mrf.mxu0  ;;  %v992_v20 = vpop.f32.mrf.mxu1 }
 0x1f0   : > { %1098 = vst [vmem:[#allocation2 + $0x28] sm:$0xff] %v1034_v17  ;;  %1130 = vst [vmem:[#allocation2 + $0x190] sm:$0xff] %v1066_v18  ;;  %v1035_v23 = vadd.f32 %v912_v19, %v394_v15  ;;  %v1067_v24 = vadd.f32 %v992_v20, %v426_v16 }
 0x1f1   : > { %v914_v25 = vpop.f32.mrf.mxu0  ;;  %v994_v26 = vpop.f32.mrf.mxu1 }
 0x1f2   : > { %1099 = vst [vmem:[#allocation2 + $0x1e8] sm:$0xff] %v1035_v23  ;;  %1131 = vst [vmem:[#allocation2 + $0x198] sm:$0xff] %v1067_v24  ;;  %v1036_v29 = vadd.f32 %v914_v25, %v395_v21  ;;  %v1068_v30 = vadd.f32 %v994_v26, %v427_v22 }
 0x1f3   : > { %v916_v31 = vpop.f32.mrf.mxu0  ;;  %v996_v32 = vpop.f32.mrf.mxu1 }
 0x1f4   : > { %1100 = vst [vmem:[#allocation2 + $0xf8] sm:$0xff] %v1036_v29  ;;  %1132 = vst [vmem:[#allocation2 + $0x38] sm:$0xff] %v1068_v30  ;;  %v1037_v35 = vadd.f32 %v916_v31, %v396_v27  ;;  %v1069_v36 = vadd.f32 %v996_v32, %v428_v28 }
 0x1f5   : > { %v918_v37 = vpop.f32.mrf.mxu0  ;;  %v998_v38 = vpop.f32.mrf.mxu1 }
 0x1f6   : > { %1101 = vst [vmem:[#allocation2 + $0x160] sm:$0xff] %v1037_v35  ;;  %1133 = vst [vmem:[#allocation2 + $0xc0] sm:$0xff] %v1069_v36  ;;  %v1038_v41 = vadd.f32 %v918_v37, %v397_v33  ;;  %v1070_v42 = vadd.f32 %v998_v38, %v429_v34 }
 0x1f7   : > { %v922_v43 = vpop.f32.mrf.mxu0  ;;  %v1002_v44 = vpop.f32.mrf.mxu1 }
 0x1f8   : > { %1102 = vst [vmem:[#allocation2 + $0x30] sm:$0xff] %v1038_v41  ;;  %1134 = vst [vmem:[#allocation2 + $0x1c0] sm:$0xff] %v1070_v42  ;;  %v1039_v47 = vadd.f32 %v922_v43, %v398_v39  ;;  %v1071_v48 = vadd.f32 %v1002_v44, %v430_v40 }
 0x1f9   : > { %v924_v49 = vpop.f32.mrf.mxu0  ;;  %v1004_v50 = vpop.f32.mrf.mxu1 }
 0x1fa   : > { %1103 = vst [vmem:[#allocation2 + $0x1e0] sm:$0xff] %v1039_v47  ;;  %1135 = vst [vmem:[#allocation2 + $0x158] sm:$0xff] %v1071_v48  ;;  %v1040_v53 = vadd.f32 %v924_v49, %v399_v45  ;;  %v1072_v54 = vadd.f32 %v1004_v50, %v431_v46 }
 0x1fb   : > { %v926_v55 = vpop.f32.mrf.mxu0  ;;  %v1006_v56 = vpop.f32.mrf.mxu1 }
 0x1fc   : > { %1104 = vst [vmem:[#allocation2] sm:$0xff] %v1040_v53  ;;  %1136 = vst [vmem:[#allocation2 + $0x10] sm:$0xff] %v1072_v54  ;;  %v1041_v59 = vadd.f32 %v926_v55, %v400_v51  ;;  %v1073_v60 = vadd.f32 %v1006_v56, %v432_v52  ;;  %1142 = sbr.rel (%p1753_p7) target bundleno = 550 (0x226), region = 52 }
 0x1fd   : > { %v928_v61 = vpop.f32.mrf.mxu0  ;;  %v1008_v62 = vpop.f32.mrf.mxu1 }
 0x1fe   : > { %1105 = vst [vmem:[#allocation2 + $0xf0] sm:$0xff] %v1041_v59  ;;  %1137 = vst [vmem:[#allocation2 + $0x58] sm:$0xff] %v1073_v60  ;;  %v1042_v63 = vadd.f32 %v928_v61, %v401_v57  ;;  %v1074_v0 = vadd.f32 %v1008_v62, %v433_v58 }
 0x200   : > { %1106 = vst [vmem:[#allocation2 + $0x8] sm:$0xff] %v1042_v63  ;;  %1138 = vst [vmem:[#allocation2 + $0xa0] sm:$0xff] %v1074_v0 }
 0x201   : > { %v1209_v1 = vlaneseq  ;;  %v1207_v3 = vld [vmem:[%s262_s24] sm:$0x3]  ;;  %v1143_v4 = vld [vmem:[#allocation2 + $0xb0] sm:$0xff]  ;;  %v1145_v8 = vld [vmem:[#allocation2 + $0xd8] sm:$0xff] }
 0x202   : > { %v1144_v5 = vld [vmem:[#allocation2 + $0x1b0] sm:$0xff]  ;;  %v1146_v9 = vld [vmem:[#allocation2 + $0x18] sm:$0xff]  ;;  %v1148_v13 = vld [vmem:[#allocation2 + $0x168] sm:$0xff] }
 0x203   : > { %v1210_v2 = vshrl.u32 %v1209_v1, 7  ;;  %v1147_v10 = vld [vmem:[#allocation2 + $0x50] sm:$0xff]  ;;  %v1150_v15 = vld [vmem:[#allocation2 + $0x48] sm:$0xff]  ;;  %v1151_v16 = vld [vmem:[#allocation2 + $0x180] sm:$0xff] }
 0x204   : > { %v1149_v14 = vld [vmem:[#allocation2 + $0x130] sm:$0xff]  ;;  %v1153_v22 = vld [vmem:[#allocation2 + $0x118] sm:$0xff]  ;;  %v1155_v28 = vld [vmem:[#allocation2 + $0x120] sm:$0xff] }
 0x205   : > { %v1211_v6 = vsub.s32 0, %v1210_v2  ;;  %v1215_v7 = vsub.s32 1, %v1210_v2  ;;  %v1152_v17 = vld [vmem:[#allocation2 + $0x110] sm:$0xff]  ;;  %v1154_v23 = vld [vmem:[#allocation2 + $0x98] sm:$0xff]  ;;  %v1157_v30 = vld [vmem:[#allocation2 + $0x108] sm:$0xff] }
 0x206   : > { %v1156_v29 = vld [vmem:[#allocation2 + $0x150] sm:$0xff]  ;;  %v1158_v35 = vld [vmem:[#allocation2 + $0x60] sm:$0xff]  ;;  %v1160_v37 = vld [vmem:[#allocation2 + $0x188] sm:$0xff] }
 0x207   : > { %v2894_v11 = vrot.slane %v1207_v3, %v1211_v6  ;;  %v2896_v12 = vrot.slane %v1207_v3, %v1215_v7  ;;  %v1159_v36 = vld [vmem:[#allocation2 + $0xe0] sm:$0xff]  ;;  %v1161_v42 = vld [vmem:[#allocation2 + $0x138] sm:$0xff]  ;;  %v1164_v49 = vld [vmem:[#allocation2 + $0x1a8] sm:$0xff] }
 0x208   : > { %v1162_v43 = vld [vmem:[#allocation2 + $0x140] sm:$0xff]  ;;  %v1165_v50 = vld [vmem:[#allocation2 + $0x1b8] sm:$0xff]  ;;  %v1166_v55 = vld [vmem:[#allocation2 + $0x28] sm:$0xff] }
 0x209   : > { %v1219_v18 = vadd.f32 %v2894_v11, %v1143_v4  ;;  %v1220_v19 = vadd.f32 %v2896_v12, %v1144_v5  ;;  %v1221_v20 = vadd.f32 %v2894_v11, %v1145_v8  ;;  %v1222_v21 = vadd.f32 %v2896_v12, %v1146_v9  ;;  %v1163_v44 = vld [vmem:[#allocation2 + $0x80] sm:$0xff]  ;;  %v1167_v56 = vld [vmem:[#allocation2 + $0x1e8] sm:$0xff]  ;;  %v1168_v57 = vld [vmem:[#allocation2 + $0xf8] sm:$0xff] }
 0x20a   : > { %v1223_v24 = vadd.f32 %v2894_v11, %v1147_v10  ;;  %v1224_v25 = vadd.f32 %v2896_v12, %v1148_v13  ;;  %v1225_v26 = vadd.f32 %v2894_v11, %v1149_v14  ;;  %v1226_v27 = vadd.f32 %v2896_v12, %v1150_v15  ;;  %v1169_v62 = vld [vmem:[#allocation2 + $0x160] sm:$0xff]  ;;  %v1170_v63 = vld [vmem:[#allocation2 + $0x30] sm:$0xff]  ;;  %v1174_v13 = vld [vmem:[#allocation2 + $0x8] sm:$0xff] }
 0x20b   : > { %v1795_v31 = vpack.c.bf16 %v1220_v19, %v1219_v18  ;;  %v1796_v32 = vpack.c.bf16 %v1222_v21, %v1221_v20  ;;  %v1227_v33 = vadd.f32 %v2894_v11, %v1151_v16  ;;  %v1228_v34 = vadd.f32 %v2896_v12, %v1152_v17  ;;  %v1171_v0 = vld [vmem:[#allocation2 + $0x1e0] sm:$0xff]  ;;  %v1173_v6 = vld [vmem:[#allocation2 + $0xf0] sm:$0xff]  ;;  %v1175_v14 = vld [vmem:[#allocation2 + $0x148] sm:$0xff] }
 0x20c   : > { %v1797_v38 = vpack.c.bf16 %v1224_v25, %v1223_v24  ;;  %v1798_v39 = vpack.c.bf16 %v1226_v27, %v1225_v26  ;;  %v1229_v40 = vadd.f32 %v2894_v11, %v1153_v22  ;;  %v1230_v41 = vadd.f32 %v2896_v12, %v1154_v23  ;;  %v1172_v5 = vld [vmem:[#allocation2] sm:$0xff]  ;;  %v1176_v15 = vld [vmem:[#allocation2 + $0x1d0] sm:$0xff]  ;;  %v1178_v21 = vld [vmem:[#allocation2 + $0xc8] sm:$0xff] }
 0x20d   : > { %1475 = vst [vmem:[%s2760_s18] sm:$0xff] %v1795_v31  ;;  %1476 = vst [vmem:[%s2760_s18 + $0x8] sm:$0xff] %v1796_v32  ;;  %v1799_v45 = vpack.c.bf16 %v1228_v34, %v1227_v33  ;;  %v1231_v46 = vadd.f32 %v2894_v11, %v1155_v28  ;;  %v1232_v47 = vadd.f32 %v2896_v12, %v1156_v29  ;;  %v1177_v20 = vld [vmem:[#allocation2 + $0x100] sm:$0xff]  ;;  %v1180_v27 = vld [vmem:[#allocation2 + $0x1f8] sm:$0xff] }
 0x20e   : > { %v1233_v48 = vadd.f32 %v2894_v11, %v1157_v30  ;;  %1477 = vst [vmem:[%s2760_s18 + $0x10] sm:$0xff] %v1797_v38  ;;  %1478 = vst [vmem:[%s2760_s18 + $0x18] sm:$0xff] %v1798_v39  ;;  %v1800_v51 = vpack.c.bf16 %v1230_v41, %v1229_v40  ;;  %v1234_v52 = vadd.f32 %v2896_v12, %v1158_v35  ;;  %v1179_v22 = vld [vmem:[#allocation2 + $0x40] sm:$0xff]  ;;  %v1182_v33 = vld [vmem:[#allocation2 + $0x128] sm:$0xff] }
 0x20f   : > { %v1235_v53 = vadd.f32 %v2894_v11, %v1159_v36  ;;  %v1236_v54 = vadd.f32 %v2896_v12, %v1160_v37  ;;  %1479 = vst [vmem:[%s2760_s18 + $0x20] sm:$0xff] %v1799_v45  ;;  %v1801_v58 = vpack.c.bf16 %v1232_v47, %v1231_v46  ;;  %v1237_v59 = vadd.f32 %v2894_v11, %v1161_v42  ;;  %v1181_v28 = vld [vmem:[#allocation2 + $0x20] sm:$0xff]  ;;  %v1184_v35 = vld [vmem:[#allocation2 + $0x1f0] sm:$0xff]  ;;  %v1185_v40 = vld [vmem:[#allocation2 + $0xe8] sm:$0xff] }
 0x210   : > { %v1238_v60 = vadd.f32 %v2896_v12, %v1162_v43  ;;  %v1239_v61 = vadd.f32 %v2894_v11, %v1163_v44  ;;  %1480 = vst [vmem:[%s2760_s18 + $0x28] sm:$0xff] %v1800_v51  ;;  %v1802_v1 = vpack.c.bf16 %v1234_v52, %v1233_v48  ;;  %v1240_v3 = vadd.f32 %v2896_v12, %v1164_v49  ;;  %v1183_v34 = vld [vmem:[#allocation2 + $0x1a0] sm:$0xff]  ;;  %v1186_v41 = vld [vmem:[#allocation2 + $0x78] sm:$0xff]  ;;  %v1187_v42 = vld [vmem:[#allocation2 + $0x70] sm:$0xff] }
 0x211   : > { %v1803_v2 = vpack.c.bf16 %v1236_v54, %v1235_v53  ;;  %v1241_v4 = vadd.f32 %v2894_v11, %v1165_v50  ;;  %1481 = vst [vmem:[%s2760_s18 + $0x30] sm:$0xff] %v1801_v58  ;;  %v1242_v8 = vadd.f32 %v2896_v12, %v1166_v55  ;;  %v1243_v9 = vadd.f32 %v2894_v11, %v1167_v56  ;;  %v1188_v47 = vld [vmem:[#allocation2 + $0x90] sm:$0xff]  ;;  %v1189_v48 = vld [vmem:[#allocation2 + $0x1d8] sm:$0xff]  ;;  %v1192_v55 = vld [vmem:[#allocation2 + $0x88] sm:$0xff] }
 0x212   : > { %v1804_v7 = vpack.c.bf16 %v1238_v60, %v1237_v59  ;;  %v1244_v10 = vadd.f32 %v2896_v12, %v1168_v57  ;;  %1482 = vst [vmem:[%s2760_s18 + $0x38] sm:$0xff] %v1802_v1  ;;  %v1805_v16 = vpack.c.bf16 %v1240_v3, %v1239_v61  ;;  %v1245_v17 = vadd.f32 %v2894_v11, %v1169_v62  ;;  %v1190_v53 = vld [vmem:[#allocation2 + $0xd0] sm:$0xff]  ;;  %v1191_v54 = vld [vmem:[#allocation2 + $0xb8] sm:$0xff]  ;;  %v1193_v60 = vld [vmem:[#allocation2 + $0xa8] sm:$0xff] }
 0x213   : > { %1483 = vst [vmem:[%s2760_s18 + $0x40] sm:$0xff] %v1803_v2  ;;  %v1246_v18 = vadd.f32 %v2896_v12, %v1170_v63  ;;  %v1247_v19 = vadd.f32 %v2894_v11, %v1171_v0  ;;  %v1806_v23 = vpack.c.bf16 %v1242_v8, %v1241_v4  ;;  %v1248_v25 = vadd.f32 %v2896_v12, %v1172_v5  ;;  %v1194_v61 = vld [vmem:[#allocation2 + $0x1c8] sm:$0xff]  ;;  %v1195_v62 = vld [vmem:[#allocation2 + $0x170] sm:$0xff]  ;;  %v1196_v3 = vld [vmem:[#allocation2 + $0x178] sm:$0xff] }
 0x214   : > { %1484 = vst [vmem:[%s2760_s18 + $0x48] sm:$0xff] %v1804_v7  ;;  %v1807_v24 = vpack.c.bf16 %v1244_v10, %v1243_v9  ;;  %v1249_v26 = vadd.f32 %v2894_v11, %v1173_v6  ;;  %1485 = vst [vmem:[%s2760_s18 + $0x50] sm:$0xff] %v1805_v16  ;;  %v1250_v30 = vadd.f32 %v2896_v12, %v1174_v13  ;;  %v1197_v4 = vld [vmem:[#allocation2 + $0x68] sm:$0xff]  ;;  %v1198_v9 = vld [vmem:[#allocation2 + $0x190] sm:$0xff] }
 0x215   : > { %v1808_v29 = vpack.c.bf16 %v1246_v18, %v1245_v17  ;;  %v1251_v31 = vadd.f32 %v2894_v11, %v1175_v14  ;;  %v1252_v32 = vadd.f32 %v2896_v12, %v1176_v15  ;;  %1486 = vst [vmem:[%s2760_s18 + $0x58] sm:$0xff] %v1806_v23  ;;  %v1809_v36 = vpack.c.bf16 %v1248_v25, %v1247_v19  ;;  %v1199_v10 = vld [vmem:[#allocation2 + $0x198] sm:$0xff]  ;;  %v1201_v18 = vld [vmem:[#allocation2 + $0xc0] sm:$0xff]  ;;  %v1204_v25 = vld [vmem:[#allocation2 + $0x10] sm:$0xff] }
 0x216   : > { %1487 = vst [vmem:[%s2760_s18 + $0x60] sm:$0xff] %v1807_v24  ;;  %v1253_v37 = vadd.f32 %v2894_v11, %v1177_v20  ;;  %v1254_v38 = vadd.f32 %v2896_v12, %v1178_v21  ;;  %v1255_v39 = vadd.f32 %v2894_v11, %v1179_v22  ;;  %v1810_v43 = vpack.c.bf16 %v1250_v30, %v1249_v26  ;;  %v1200_v13 = vld [vmem:[#allocation2 + $0x38] sm:$0xff]  ;;  %v1202_v19 = vld [vmem:[#allocation2 + $0x1c0] sm:$0xff] }
 0x217   : > { %1488 = vst [vmem:[%s2760_s18 + $0x68] sm:$0xff] %v1808_v29  ;;  %v1811_v44 = vpack.c.bf16 %v1252_v32, %v1251_v31  ;;  %v1256_v45 = vadd.f32 %v2896_v12, %v1180_v27  ;;  %v1257_v46 = vadd.f32 %v2894_v11, %v1181_v28  ;;  %1489 = vst [vmem:[%s2760_s18 + $0x70] sm:$0xff] %v1809_v36  ;;  %v1203_v20 = vld [vmem:[#allocation2 + $0x158] sm:$0xff]  ;;  %v1206_v31 = vld [vmem:[#allocation2 + $0xa0] sm:$0xff] }
 0x218   : > { %v1812_v49 = vpack.c.bf16 %v1254_v38, %v1253_v37  ;;  %v1258_v50 = vadd.f32 %v2896_v12, %v1182_v33  ;;  %v1259_v51 = vadd.f32 %v2894_v11, %v1183_v34  ;;  %v1260_v52 = vadd.f32 %v2896_v12, %v1184_v35  ;;  %1490 = vst [vmem:[%s2760_s18 + $0x78] sm:$0xff] %v1810_v43  ;;  %v1205_v26 = vld [vmem:[#allocation2 + $0x58] sm:$0xff] }
 0x219   : > { %1491 = vst [vmem:[%s2760_s18 + $0x80] sm:$0xff] %v1811_v44  ;;  %v1813_v56 = vpack.c.bf16 %v1256_v45, %v1255_v39  ;;  %v1261_v57 = vadd.f32 %v2894_v11, %v1185_v40  ;;  %v1262_v58 = vadd.f32 %v2896_v12, %v1186_v41  ;;  %v1263_v59 = vadd.f32 %v2894_v11, %v1187_v42 }
 0x21a   : > { %1492 = vst [vmem:[%s2760_s18 + $0x88] sm:$0xff] %v1812_v49  ;;  %v1814_v63 = vpack.c.bf16 %v1258_v50, %v1257_v46  ;;  %v1815_v0 = vpack.c.bf16 %v1260_v52, %v1259_v51  ;;  %v1264_v1 = vadd.f32 %v2896_v12, %v1188_v47  ;;  %v1265_v2 = vadd.f32 %v2894_v11, %v1189_v48 }
 0x21b   : > { %1493 = vst [vmem:[%s2760_s18 + $0x90] sm:$0xff] %v1813_v56  ;;  %v1816_v5 = vpack.c.bf16 %v1262_v58, %v1261_v57  ;;  %v1266_v6 = vadd.f32 %v2896_v12, %v1190_v53  ;;  %v1267_v7 = vadd.f32 %v2894_v11, %v1191_v54  ;;  %v1268_v8 = vadd.f32 %v2896_v12, %v1192_v55 }
 0x21c   : > { %1494 = vst [vmem:[%s2760_s18 + $0x98] sm:$0xff] %v1814_v63  ;;  %1495 = vst [vmem:[%s2760_s18 + $0xa0] sm:$0xff] %v1815_v0  ;;  %v1817_v14 = vpack.c.bf16 %v1264_v1, %v1263_v59  ;;  %v1269_v15 = vadd.f32 %v2894_v11, %v1193_v60  ;;  %v1270_v16 = vadd.f32 %v2896_v12, %v1194_v61 }
 0x21d   : > { %v1271_v17 = vadd.f32 %v2894_v11, %v1195_v62  ;;  %1496 = vst [vmem:[%s2760_s18 + $0xa8] sm:$0xff] %v1816_v5  ;;  %v1818_v21 = vpack.c.bf16 %v1266_v6, %v1265_v2  ;;  %v1819_v22 = vpack.c.bf16 %v1268_v8, %v1267_v7  ;;  %v1272_v23 = vadd.f32 %v2896_v12, %v1196_v3 }
 0x21e   : > { %v1273_v24 = vadd.f32 %v2894_v11, %v1197_v4  ;;  %1497 = vst [vmem:[%s2760_s18 + $0xb0] sm:$0xff] %v1817_v14  ;;  %v1820_v27 = vpack.c.bf16 %v1270_v16, %v1269_v15  ;;  %v1274_v28 = vadd.f32 %v2896_v12, %v1198_v9  ;;  %v1275_v29 = vadd.f32 %v2894_v11, %v1199_v10 }
 0x21f   : > { %v1276_v30 = vadd.f32 %v2896_v12, %v1200_v13  ;;  %1498 = vst [vmem:[%s2760_s18 + $0xb8] sm:$0xff] %v1818_v21  ;;  %1499 = vst [vmem:[%s2760_s18 + $0xc0] sm:$0xff] %v1819_v22  ;;  %v1821_v32 = vpack.c.bf16 %v1272_v23, %v1271_v17  ;;  %v1277_v33 = vadd.f32 %v2894_v11, %v1201_v18 }
 0x220   : > { %v1278_v34 = vadd.f32 %v2896_v12, %v1202_v19  ;;  %v1279_v35 = vadd.f32 %v2894_v11, %v1203_v20  ;;  %1500 = vst [vmem:[%s2760_s18 + $0xc8] sm:$0xff] %v1820_v27  ;;  %v1822_v36 = vpack.c.bf16 %v1274_v28, %v1273_v24  ;;  %v1280_v38 = vadd.f32 %v2896_v12, %v1204_v25 }
 0x221   : > { %v1823_v37 = vpack.c.bf16 %v1276_v30, %v1275_v29  ;;  %v1281_v39 = vadd.f32 %v2894_v11, %v1205_v26  ;;  %1501 = vst [vmem:[%s2760_s18 + $0xd0] sm:$0xff] %v1821_v32  ;;  %v1282_v41 = vadd.f32 %v2896_v12, %v1206_v31 }
 0x222   : > { %v1824_v40 = vpack.c.bf16 %v1278_v34, %v1277_v33  ;;  %1502 = vst [vmem:[%s2760_s18 + $0xd8] sm:$0xff] %v1822_v36  ;;  %v1825_v42 = vpack.c.bf16 %v1280_v38, %v1279_v35 }
 0x223   : > { %1503 = vst [vmem:[%s2760_s18 + $0xe0] sm:$0xff] %v1823_v37  ;;  %v1826_v43 = vpack.c.bf16 %v1282_v41, %v1281_v39 }
 0x224   : > { %1504 = vst [vmem:[%s2760_s18 + $0xe8] sm:$0xff] %v1824_v40  ;;  %1505 = vst [vmem:[%s2760_s18 + $0xf0] sm:$0xff] %v1825_v42 }
 0x225   : > { %1506 = vst [vmem:[%s2760_s18 + $0xf8] sm:$0xff] %v1826_v43 }
 0x226 PF: > { %s3172_s28 = sld [smem:[#allocation21_spill]]  ;;  %s1524_s0 = sshll.u32 %s2760_s18, 4  ;;  %s2997_s0 = int_to_ptr.vmem [resolvable:$true] %s1524_s0 }
 0x227   : > { %s3173_s1 = sld [smem:[#allocation22_spill]]  ;;  %s3006_s6 = scalar_lea.sflag [#allocation5], %s292_s7 }
 0x228   : > { %s3175_s12 = sld [smem:[#allocation34_spill]]  ;;  %s2225_s10 = scalar_lea.vmem %s2997_s0, 4096 }
 0x229   : > { %p2226_p0 = scmp.ne.s32.totalorder %s2997_s0, %s2225_s10  ;;  %p3177_p13 = scmp.ne.s32.totalorder %s3160_s11, 0 }
 0x22a   : > { %s2427_s18 = smov [#allocation9]  }
 0x22b   : > { %p2227_p5 = pnand %p2226_p0, %p3177_p13  ;;  %s2229_s20 = sshll.u32 %s2427_s18, 4  ;;  %s2230_s20 = int_to_ptr.vmem [resolvable:$false] %s2229_s20 }
 0x22c   : > { %s1788_s4 = sshll.u32 %s3172_s28, 1  ;;  %s2231_s21 = scalar_lea.vmem %s2230_s20, 8192 }
 0x22d   : > { %s1860_s9 = smul.u32 384, %s3173_s1  ;;  %p2228_p1 = pneg %p2227_p5 }
 0x22e   : > { %s3176_s8 = smov %s3175_s12  ;;  %p2232_p2 = scmp.lt.s32.totalorder %s2997_s0, %s2230_s20 }
 0x22f   : > { %s1521_s3 = sadd.s32 %s1860_s9, %s1788_s4  ;;  %p2233_p9 = scmp.lt.s32.totalorder %s2231_s21, %s2225_s10 }
 0x230   : > { %s1790_s5 = sshll.u32 %s1521_s3, 6 }
 0x231   : > { %s3002_s24 = scalar_lea.hbm %s3175_s12, %s1790_s5  ;;  %p2234_p6 = por %p2233_p9, %p2232_p2 }
 0x233   : > { %p2235_p11 = pnand %p2234_p6, %p2228_p1 }
 0x235   : > { %2238 = shalt.err (!%p2235_p11)
}
 0x236   : > { %s2239_s7 = scalar_lea.hbm %s3002_s24, 4096  ;;  %s2243_s13 = scalar_lea.hbm %s3176_s8, 49152 }
 0x237   : > { %p2240_p12 = scmp.ne.s32.totalorder %s3002_s24, %s2239_s7  ;;  %p2244_p10 = scmp.lt.s32.totalorder %s3002_s24, %s3176_s8 }
 0x238   : > { %p2245_p3 = scmp.lt.s32.totalorder %s2243_s13, %s2239_s7 }
 0x239   : > { %p2241_p4 = pnand %p2240_p12, %p3177_p13 }
 0x23a   : > { %p2246_p7 = por %p2245_p3, %p2244_p10 }
 0x23b   : > { %p2242_p8 = pneg %p2241_p4 }
 0x23d   : > { %p2247_p0 = pnand %p2246_p7, %p2242_p8 }
 0x23f   : > { %2250 = shalt.err (!%p2247_p0)
}
 0x240   : > { %s2428_s3 = smov 128   ;;  %s2429_s5 = smov 768  }
 0x241   : > { %s2430_s15 = smov 8  }
 0x242   : > { %1867 = dma.vmem_to_hbm [thread:$0]  (%p3177_p13), %s2997_s0, 4096, %s3002_s24, %s3006_s6, %s2428_s3, %s2429_s5, %s2430_s15  }
 0x243 PF: > { %s3178_s26 = sld [smem:[#allocation14_spill]]  ;;  %p1884_p5 = scmp.ge.s32.totalorder %s2417_s30, 2 }
 0x244   : > { %p3179_p1 = scmp.ne.s32.totalorder %s3161_s25, 0 }
 0x246   : > { %p1880_p2 = pnand %p1884_p5, %p3179_p1 }
 0x248   : > { %p1881_p9 = pneg %p1880_p2 }
 0x249   : > { %s1539_s12 = sand.u32 1, %s3178_s26  }
 0x24a   : > { %s1540_s10 = scalar_lea.sflag [#allocation5], %s1539_s12 }
 0x24b   : > { %2340 = dma.done.wait (%p1881_p9), %s1540_s10, 4096  }
 0x24c   : > { %2342 = vsyncadd (%p1881_p9), %s1540_s10, 4294963200  ;;  %s22_s30 = sadd.s32 1, %s2417_s30   ;;  %s3181_s12 = sld [smem:[#allocation15_spill]] }
 0x24d   : > { %p3034_p6 = scmp.ge.s32.totalorder %s22_s30, 26   ;;  %s3182_s15 = sld [smem:[#allocation17_spill]] }
 0x24e   : > { %s3183_s11 = sld [smem:[#allocation19_spill]]  ;;  %s3189_s13 = smov %s2353_s14 }
 0x24f   : > { %s3184_s20 = sld [smem:[#allocation27_spill]]  ;;  %s3191_s14 = smov %s2644_s16 }
 0x250   : > { %s3185_s24 = sld [smem:[#allocation23_spill]]  ;;  %s3193_s16 = smov %s2365_s17 }
 0x251   : > { %s3186_s25 = sld [smem:[#allocation24_spill]]  ;;  %s3194_s17 = smov %s2685_s27 }
 0x252   : > { %s3187_s0 = sld [smem:[#allocation25_spill]]  ;;  %s3195_s18 = smov %s2373_s19 }
 0x253   : > { %s3188_s28 = sld [smem:[#allocation26_spill]]  ;;  %s3197_s21 = smov %s2385_s22 }
 0x254   : > { %s3190_s6 = sld [smem:[#allocation30_spill]]  ;;  %s3196_s19 = smov %s3183_s11 }
 0x255   : > { %s3198_s22 = smov %s2389_s23  ;;  %s3199_s23 = smov %s2641_s2 }
 0x256   : > { %s3200_s26 = smov %s2413_s29  ;;  %21 = sbr.rel (!%p3034_p6) target bundleno = 20 (0x14), region = 109 }
 0x258   : > { %s3201_s27 = smov %s3187_s0 }
 0x25a   : > { %s3202_s29 = smov %s3190_s6 }
 0x25b   :  { %1545 = vsyncpa [#allocation4], 1 }
 0x25c   :  { %1547 = vsyncpa [#allocation4 + $0x1], 1 }
 0x25d   :  { %1548 = vsyncpa [#allocation7], 1 }
 0x25e   :  { %1550 = vsyncpa [#allocation7 + $0x1], 1 }
 0x25f   :  { %1551 = vsyncpa [#allocation5], 1 }
 0x260   :  { %1553 = vsyncpa [#allocation5 + $0x1], 1 }

</bundles_post_ra>
